<compile_context>
chip_gen: v7x
topology: tpu7x:2x2x1
jax: 0.10.0
libtpu: 0.0.40
codegen_flags: <defaults>
</compile_context>

<pallas_src>
import numpy as np
import jax
import jax.numpy as jnp
from jax.experimental import pallas as pl
from jax.experimental.pallas import tpu as pltpu

IMG_SIZE = 608.0
NUM_FEATS = 85          # 4 box + 1 conf + 80 classes
NUM_CLASSES = 80
NUM_ANCHORS = 3         # anchors selected by 'mask'
OUT_FEATS = 6
OUT_PAD = 8             # padded output rows for full-sublane stores


def _make_yolo_kernel(scale: int, anchors):
    ss = scale * scale
    k = float(IMG_SIZE) / float(scale)
    anchors = [(float(w), float(h)) for (w, h) in anchors]

    def kernel(off_ref, x_ref, o_ref):
        # off_ref: VMEM f32 (2, SS)     row0 = col*(608/S), row1 = row*(608/S)
        # x_ref:   VMEM f32 (3, 85, SS) all anchors of one image
        # o_ref:   VMEM f32 (3, 8, SS)  padded output (rows 6..7 zeroed)
        off = off_ref[...]                              # resident constant block
        zeros2 = jnp.zeros((2, ss), jnp.float32)

        for a in range(NUM_ANCHORS):                    # static unroll, 3 anchors
            aw, ah = anchors[a]

            head = x_ref[a, 0:5, :]                     # (5, SS): tx,ty,tw,th,conf
            sig = jax.nn.sigmoid(head)                  # one EUP pass (5 sublanes)
            ewh = jnp.exp(head[2:4, :])                 # one EUP pass (2 sublanes)

            # (sigmoid(t) + cell_off)/scale*608  ==  sigmoid(t)*k + prescaled_off
            o_ref[a, 0:2, :] = sig[0:2, :] * k + off
            o_ref[a, 2:3, :] = ewh[0:1, :] * aw
            o_ref[a, 3:4, :] = ewh[1:2, :] * ah
            o_ref[a, 4:5, :] = sig[4:5, :]

            # argmax over 80 class logits (first-max-wins) as max + min-of-index;
            # robust Mosaic lowering for a sublane-axis argmax.
            cls = x_ref[a, 5:, :]                       # (80, SS)
            cls_max = jnp.max(cls, axis=0, keepdims=True)
            idx = jax.lax.broadcasted_iota(jnp.int32, cls.shape, 0)
            cand = jnp.where(cls >= cls_max, idx, NUM_CLASSES)
            o_ref[a, 5:6, :] = jnp.min(cand, axis=0, keepdims=True).astype(jnp.float32)

            o_ref[a, 6:8, :] = zeros2                   # deterministic padding rows

    return kernel


def yolo_layer(x, anchors, training=False):
    """x: (B, 255, S, S) float32.  anchors: list of 3 (w, h) pairs."""
    b, c, s, s2 = x.shape
    assert c == NUM_ANCHORS * NUM_FEATS and s == s2
    x5 = x.reshape(b, NUM_ANCHORS, NUM_FEATS, s, s)

    if training:
        # training branch is pure reshape/permute -> plain JAX glue
        return jnp.transpose(x5, (0, 1, 3, 4, 2))

    ss = s * s
    xk = x5.reshape(b, NUM_ANCHORS, NUM_FEATS, ss)

    # Pre-scaled spatial cell offsets (computed once on host, stays resident:
    # its block index never changes across grid steps).
    k = IMG_SIZE / s
    p = np.arange(ss)
    off = jnp.asarray(np.stack([(p % s).astype(np.float32) * k,
                                (p // s).astype(np.float32) * k], axis=0))  # (2, SS)

    # Raise the scoped-VMEM limit only if the per-step working set needs it
    # (double-buffered input + output + resident offsets), capped below v7x's
    # 64 MiB physical VMEM.
    block_bytes = 4 * ss * (NUM_ANCHORS * NUM_FEATS + NUM_ANCHORS * OUT_PAD + 2)
    params = {"dimension_semantics": ("parallel",)}
    need = 2 * block_bytes + (2 << 20)
    if need > (24 << 20):
        params["vmem_limit_bytes"] = min(need, 48 << 20)

    out = pl.pallas_call(
        _make_yolo_kernel(s, anchors),
        out_shape=jax.ShapeDtypeStruct((b, NUM_ANCHORS, OUT_PAD, ss), jnp.float32),
        grid=(b,),
        in_specs=[
            pl.BlockSpec((2, ss), lambda i: (0, 0)),
            pl.BlockSpec((None, NUM_ANCHORS, NUM_FEATS, ss), lambda i: (i, 0, 0, 0)),
        ],
        out_specs=pl.BlockSpec((None, NUM_ANCHORS, OUT_PAD, ss),
                               lambda i: (i, 0, 0, 0)),
        compiler_params=pltpu.CompilerParams(**params),
    )(off, xk)

    # (B, 3, 8, SS) -> (B, 3, SS, 8) (aligned transpose) -> slice 6 -> (B, 3*SS, 6)
    out = jnp.transpose(out, (0, 1, 3, 2))[..., :OUT_FEATS]
    return out.reshape(b, NUM_ANCHORS * ss, OUT_FEATS)


def yolo_layer_ref(x, anchors):
    """Pure-JAX reference reproducing the PyTorch eval forward."""
    b, c, s, _ = x.shape
    xp = jnp.transpose(x.reshape(b, NUM_ANCHORS, NUM_FEATS, s, s),
                       (0, 1, 3, 4, 2))                      # (B,3,S,S,85)
    anch = jnp.asarray(anchors, jnp.float32).reshape(1, NUM_ANCHORS, 1, 1, 2)
    col = jnp.arange(s, dtype=jnp.float32).reshape(1, 1, 1, s, 1)
    row = jnp.arange(s, dtype=jnp.float32).reshape(1, 1, s, 1, 1)
    px = (jax.nn.sigmoid(xp[..., 0:1]) + col) / s * IMG_SIZE
    py = (jax.nn.sigmoid(xp[..., 1:2]) + row) / s * IMG_SIZE
    pwh = jnp.exp(xp[..., 2:4]) * anch
    pc = jax.nn.sigmoid(xp[..., 4:5])
    po = jnp.argmax(xp[..., 5:], axis=-1)[..., None].astype(jnp.float32)
    out = jnp.concatenate([px, py, pwh, pc, po], axis=-1)
    return out.reshape(b, -1, 6)


if __name__ == "__main__":
    # Deterministic "config" (standard YOLOv3 last-scale yolo layer).
    config = {
        "mask": "6,7,8",
        "anchors": "10,13,16,30,33,23,30,61,62,45,59,119,116,90,156,198,373,326",
        "classes": "80",
        "num": "9",
        "jitter": ".3",
        "ignore_thresh": ".7",
        "truth_thresh": "1",
        "random": "1",
    }
    mask = [int(m) for m in config["mask"].split(",")]
    all_a = [int(v) for v in config["anchors"].split(",")]
    pairs = [(all_a[2 * i], all_a[2 * i + 1]) for i in range(int(config["num"]))]
    anchors = [pairs[i] for i in mask]               # [(116,90),(156,198),(373,326)]

    key = jax.random.PRNGKey(0)
    batch, scale = 2, 16
    x = jax.random.normal(key, (batch, 255, scale, scale), dtype=jnp.float32)

    out = yolo_layer(x, anchors, training=False)
    out = jax.block_until_ready(out)

    ref = jax.block_until_ready(yolo_layer_ref(x, anchors))
    assert out.shape == (batch, 3 * scale * scale, 6), out.shape
    np.testing.assert_allclose(np.asarray(out), np.asarray(ref),
                               rtol=1e-5, atol=1e-4)
    print("KERNEL_OK")
</pallas_src>

<mosaic_0001>
module attributes {stable_mosaic.version = 11 : i64} {
  func.func @kernel(%arg0: i32, %arg1: memref<2x256xf32, #tpu.memory_space<vmem>>, %arg2: memref<1x3x85x256xf32, #tpu.memory_space<vmem>>, %arg3: memref<1x3x8x256xf32, #tpu.memory_space<vmem>>) attributes {dimension_semantics = [#tpu.dimension_semantics<parallel>], iteration_bounds = array<i64: 2>, scalar_prefetch = 0 : i64, scratch_operands = 0 : i64, tpu.core_type = #tpu.core_type<tc>, window_params = [{pipeline_mode = #tpu.pipeline_mode<synchronous>, transform_indices = @transform_0, window_bounds = array<i64: 2, 256>}, {transform_indices = @transform_1, window_bounds = array<i64: 1, 3, 85, 256>}, {transform_indices = @transform_2, window_bounds = array<i64: 1, 3, 8, 256>}]} {
    %c0 = arith.constant 0 : index
    %c0_0 = arith.constant 0 : index
    %0 = vector.load %arg1[%c0, %c0_0] : memref<2x256xf32, #tpu.memory_space<vmem>>, vector<2x256xf32>
    %cst = arith.constant 0.000000e+00 : f32
    %1 = vector.broadcast %cst : f32 to vector<2x256xf32>
    %c0_1 = arith.constant 0 : index
    %c0_2 = arith.constant 0 : index
    %c0_3 = arith.constant 0 : index
    %c0_4 = arith.constant 0 : index
    %2 = vector.load %arg2[%c0_1, %c0_2, %c0_3, %c0_4] : memref<1x3x85x256xf32, #tpu.memory_space<vmem>>, vector<1x1x5x256xf32>
    %3 = vector.shape_cast %2 : vector<1x1x5x256xf32> to vector<5x256xf32>
    %4 = arith.negf %3 : vector<5x256xf32>
    %5 = math.exp %4 : vector<5x256xf32>
    %cst_5 = arith.constant 1.000000e+00 : f32
    %6 = vector.broadcast %cst_5 : f32 to vector<5x256xf32>
    %7 = arith.addf %6, %5 : vector<5x256xf32>
    %8 = arith.divf %6, %7 : vector<5x256xf32>
    %9 = vector.extract_strided_slice %3 {offsets = [2, 0], sizes = [2, 256], strides = [1, 1]} : vector<5x256xf32> to vector<2x256xf32>
    %10 = math.exp %9 : vector<2x256xf32>
    %11 = vector.extract_strided_slice %8 {offsets = [0, 0], sizes = [2, 256], strides = [1, 1]} : vector<5x256xf32> to vector<2x256xf32>
    %cst_6 = arith.constant 3.800000e+01 : f32
    %12 = vector.broadcast %cst_6 : f32 to vector<2x256xf32>
    %13 = arith.mulf %11, %12 : vector<2x256xf32>
    %14 = arith.addf %13, %0 : vector<2x256xf32>
    %c0_7 = arith.constant 0 : index
    %c0_8 = arith.constant 0 : index
    %c0_9 = arith.constant 0 : index
    %c0_10 = arith.constant 0 : index
    %15 = vector.load %arg3[%c0_7, %c0_8, %c0_9, %c0_10] : memref<1x3x8x256xf32, #tpu.memory_space<vmem>>, vector<1x1x2x256xf32>
    %16 = vector.shape_cast %15 : vector<1x1x2x256xf32> to vector<2x256xf32>
    %17 = vector.shape_cast %14 : vector<2x256xf32> to vector<1x1x2x256xf32>
    tpu.vector_store %arg3[%c0_7, %c0_8, %c0_9, %c0_10], %17 {strides = array<i32>} : memref<1x3x8x256xf32, #tpu.memory_space<vmem>>, vector<1x1x2x256xf32>,
    %18 = vector.extract_strided_slice %10 {offsets = [0, 0], sizes = [1, 256], strides = [1, 1]} : vector<2x256xf32> to vector<1x256xf32>
    %cst_11 = arith.constant 1.160000e+02 : f32
    %19 = vector.broadcast %cst_11 : f32 to vector<1x256xf32>
    %20 = arith.mulf %18, %19 : vector<1x256xf32>
    %c0_12 = arith.constant 0 : index
    %c0_13 = arith.constant 0 : index
    %c2 = arith.constant 2 : index
    %c0_14 = arith.constant 0 : index
    %21 = vector.load %arg3[%c0_12, %c0_13, %c2, %c0_14] : memref<1x3x8x256xf32, #tpu.memory_space<vmem>>, vector<1x1x1x256xf32>
    %22 = vector.shape_cast %21 : vector<1x1x1x256xf32> to vector<1x256xf32>
    %23 = vector.shape_cast %20 : vector<1x256xf32> to vector<1x1x1x256xf32>
    tpu.vector_store %arg3[%c0_12, %c0_13, %c2, %c0_14], %23 {strides = array<i32>} : memref<1x3x8x256xf32, #tpu.memory_space<vmem>>, vector<1x1x1x256xf32>,
    %24 = vector.extract_strided_slice %10 {offsets = [1, 0], sizes = [1, 256], strides = [1, 1]} : vector<2x256xf32> to vector<1x256xf32>
    %cst_15 = arith.constant 9.000000e+01 : f32
    %25 = vector.broadcast %cst_15 : f32 to vector<1x256xf32>
    %26 = arith.mulf %24, %25 : vector<1x256xf32>
    %c0_16 = arith.constant 0 : index
    %c0_17 = arith.constant 0 : index
    %c3 = arith.constant 3 : index
    %c0_18 = arith.constant 0 : index
    %27 = vector.load %arg3[%c0_16, %c0_17, %c3, %c0_18] : memref<1x3x8x256xf32, #tpu.memory_space<vmem>>, vector<1x1x1x256xf32>
    %28 = vector.shape_cast %27 : vector<1x1x1x256xf32> to vector<1x256xf32>
    %29 = vector.shape_cast %26 : vector<1x256xf32> to vector<1x1x1x256xf32>
    tpu.vector_store %arg3[%c0_16, %c0_17, %c3, %c0_18], %29 {strides = array<i32>} : memref<1x3x8x256xf32, #tpu.memory_space<vmem>>, vector<1x1x1x256xf32>,
    %30 = vector.extract_strided_slice %8 {offsets = [4, 0], sizes = [1, 256], strides = [1, 1]} : vector<5x256xf32> to vector<1x256xf32>
    %c0_19 = arith.constant 0 : index
    %c0_20 = arith.constant 0 : index
    %c4 = arith.constant 4 : index
    %c0_21 = arith.constant 0 : index
    %31 = vector.load %arg3[%c0_19, %c0_20, %c4, %c0_21] : memref<1x3x8x256xf32, #tpu.memory_space<vmem>>, vector<1x1x1x256xf32>
    %32 = vector.shape_cast %31 : vector<1x1x1x256xf32> to vector<1x256xf32>
    %33 = vector.shape_cast %30 : vector<1x256xf32> to vector<1x1x1x256xf32>
    tpu.vector_store %arg3[%c0_19, %c0_20, %c4, %c0_21], %33 {strides = array<i32>} : memref<1x3x8x256xf32, #tpu.memory_space<vmem>>, vector<1x1x1x256xf32>,
    %c0_22 = arith.constant 0 : index
    %c0_23 = arith.constant 0 : index
    %c5 = arith.constant 5 : index
    %c0_24 = arith.constant 0 : index
    %34 = vector.load %arg2[%c0_22, %c0_23, %c5, %c0_24] : memref<1x3x85x256xf32, #tpu.memory_space<vmem>>, vector<1x1x80x256xf32>
    %35 = vector.shape_cast %34 : vector<1x1x80x256xf32> to vector<80x256xf32>
    %cst_25 = arith.constant dense<0xFF800000> : vector<256xf32>
    %36 = vector.multi_reduction <maximumf>, %35, %cst_25 [0] : vector<80x256xf32> to vector<256xf32>
    %37 = vector.shape_cast %36 : vector<256xf32> to vector<1x256xf32>
    %38 = tpu.iota {dimensions = array<i32: 0>} : vector<80x256xi32>
    %39 = vector.broadcast %37 : vector<1x256xf32> to vector<80x256xf32>
    %40 = arith.cmpf oge, %35, %39 : vector<80x256xf32>
    %c80_i32 = arith.constant 80 : i32
    %41 = vector.broadcast %c80_i32 : i32 to vector<80x256xi32>
    %42 = arith.select %40, %38, %41 : vector<80x256xi1>, vector<80x256xi32>
    %cst_26 = arith.constant dense<2147483647> : vector<256xi32>
    %43 = vector.multi_reduction <minsi>, %42, %cst_26 [0] : vector<80x256xi32> to vector<256xi32>
    %44 = vector.shape_cast %43 : vector<256xi32> to vector<1x256xi32>
    %45 = arith.sitofp %44 : vector<1x256xi32> to vector<1x256xf32>
    %c0_27 = arith.constant 0 : index
    %c0_28 = arith.constant 0 : index
    %c5_29 = arith.constant 5 : index
    %c0_30 = arith.constant 0 : index
    %46 = vector.load %arg3[%c0_27, %c0_28, %c5_29, %c0_30] : memref<1x3x8x256xf32, #tpu.memory_space<vmem>>, vector<1x1x1x256xf32>
    %47 = vector.shape_cast %46 : vector<1x1x1x256xf32> to vector<1x256xf32>
    %48 = vector.shape_cast %45 : vector<1x256xf32> to vector<1x1x1x256xf32>
    tpu.vector_store %arg3[%c0_27, %c0_28, %c5_29, %c0_30], %48 {strides = array<i32>} : memref<1x3x8x256xf32, #tpu.memory_space<vmem>>, vector<1x1x1x256xf32>,
    %c0_31 = arith.constant 0 : index
    %c0_32 = arith.constant 0 : index
    %c6 = arith.constant 6 : index
    %c0_33 = arith.constant 0 : index
    %49 = vector.load %arg3[%c0_31, %c0_32, %c6, %c0_33] : memref<1x3x8x256xf32, #tpu.memory_space<vmem>>, vector<1x1x2x256xf32>
    %50 = vector.shape_cast %49 : vector<1x1x2x256xf32> to vector<2x256xf32>
    %51 = vector.shape_cast %1 : vector<2x256xf32> to vector<1x1x2x256xf32>
    tpu.vector_store %arg3[%c0_31, %c0_32, %c6, %c0_33], %51 {strides = array<i32>} : memref<1x3x8x256xf32, #tpu.memory_space<vmem>>, vector<1x1x2x256xf32>,
    %c0_34 = arith.constant 0 : index
    %c1 = arith.constant 1 : index
    %c0_35 = arith.constant 0 : index
    %c0_36 = arith.constant 0 : index
    %52 = vector.load %arg2[%c0_34, %c1, %c0_35, %c0_36] : memref<1x3x85x256xf32, #tpu.memory_space<vmem>>, vector<1x1x5x256xf32>
    %53 = vector.shape_cast %52 : vector<1x1x5x256xf32> to vector<5x256xf32>
    %54 = arith.negf %53 : vector<5x256xf32>
    %55 = math.exp %54 : vector<5x256xf32>
    %cst_37 = arith.constant 1.000000e+00 : f32
    %56 = vector.broadcast %cst_37 : f32 to vector<5x256xf32>
    %57 = arith.addf %56, %55 : vector<5x256xf32>
    %58 = arith.divf %56, %57 : vector<5x256xf32>
    %59 = vector.extract_strided_slice %53 {offsets = [2, 0], sizes = [2, 256], strides = [1, 1]} : vector<5x256xf32> to vector<2x256xf32>
    %60 = math.exp %59 : vector<2x256xf32>
    %61 = vector.extract_strided_slice %58 {offsets = [0, 0], sizes = [2, 256], strides = [1, 1]} : vector<5x256xf32> to vector<2x256xf32>
    %cst_38 = arith.constant 3.800000e+01 : f32
    %62 = vector.broadcast %cst_38 : f32 to vector<2x256xf32>
    %63 = arith.mulf %61, %62 : vector<2x256xf32>
    %64 = arith.addf %63, %0 : vector<2x256xf32>
    %c0_39 = arith.constant 0 : index
    %c1_40 = arith.constant 1 : index
    %c0_41 = arith.constant 0 : index
    %c0_42 = arith.constant 0 : index
    %65 = vector.load %arg3[%c0_39, %c1_40, %c0_41, %c0_42] : memref<1x3x8x256xf32, #tpu.memory_space<vmem>>, vector<1x1x2x256xf32>
    %66 = vector.shape_cast %65 : vector<1x1x2x256xf32> to vector<2x256xf32>
    %67 = vector.shape_cast %64 : vector<2x256xf32> to vector<1x1x2x256xf32>
    tpu.vector_store %arg3[%c0_39, %c1_40, %c0_41, %c0_42], %67 {strides = array<i32>} : memref<1x3x8x256xf32, #tpu.memory_space<vmem>>, vector<1x1x2x256xf32>,
    %68 = vector.extract_strided_slice %60 {offsets = [0, 0], sizes = [1, 256], strides = [1, 1]} : vector<2x256xf32> to vector<1x256xf32>
    %cst_43 = arith.constant 1.560000e+02 : f32
    %69 = vector.broadcast %cst_43 : f32 to vector<1x256xf32>
    %70 = arith.mulf %68, %69 : vector<1x256xf32>
    %c0_44 = arith.constant 0 : index
    %c1_45 = arith.constant 1 : index
    %c2_46 = arith.constant 2 : index
    %c0_47 = arith.constant 0 : index
    %71 = vector.load %arg3[%c0_44, %c1_45, %c2_46, %c0_47] : memref<1x3x8x256xf32, #tpu.memory_space<vmem>>, vector<1x1x1x256xf32>
    %72 = vector.shape_cast %71 : vector<1x1x1x256xf32> to vector<1x256xf32>
    %73 = vector.shape_cast %70 : vector<1x256xf32> to vector<1x1x1x256xf32>
    tpu.vector_store %arg3[%c0_44, %c1_45, %c2_46, %c0_47], %73 {strides = array<i32>} : memref<1x3x8x256xf32, #tpu.memory_space<vmem>>, vector<1x1x1x256xf32>,
    %74 = vector.extract_strided_slice %60 {offsets = [1, 0], sizes = [1, 256], strides = [1, 1]} : vector<2x256xf32> to vector<1x256xf32>
    %cst_48 = arith.constant 1.980000e+02 : f32
    %75 = vector.broadcast %cst_48 : f32 to vector<1x256xf32>
    %76 = arith.mulf %74, %75 : vector<1x256xf32>
    %c0_49 = arith.constant 0 : index
    %c1_50 = arith.constant 1 : index
    %c3_51 = arith.constant 3 : index
    %c0_52 = arith.constant 0 : index
    %77 = vector.load %arg3[%c0_49, %c1_50, %c3_51, %c0_52] : memref<1x3x8x256xf32, #tpu.memory_space<vmem>>, vector<1x1x1x256xf32>
    %78 = vector.shape_cast %77 : vector<1x1x1x256xf32> to vector<1x256xf32>
    %79 = vector.shape_cast %76 : vector<1x256xf32> to vector<1x1x1x256xf32>
    tpu.vector_store %arg3[%c0_49, %c1_50, %c3_51, %c0_52], %79 {strides = array<i32>} : memref<1x3x8x256xf32, #tpu.memory_space<vmem>>, vector<1x1x1x256xf32>,
    %80 = vector.extract_strided_slice %58 {offsets = [4, 0], sizes = [1, 256], strides = [1, 1]} : vector<5x256xf32> to vector<1x256xf32>
    %c0_53 = arith.constant 0 : index
    %c1_54 = arith.constant 1 : index
    %c4_55 = arith.constant 4 : index
    %c0_56 = arith.constant 0 : index
    %81 = vector.load %arg3[%c0_53, %c1_54, %c4_55, %c0_56] : memref<1x3x8x256xf32, #tpu.memory_space<vmem>>, vector<1x1x1x256xf32>
    %82 = vector.shape_cast %81 : vector<1x1x1x256xf32> to vector<1x256xf32>
    %83 = vector.shape_cast %80 : vector<1x256xf32> to vector<1x1x1x256xf32>
    tpu.vector_store %arg3[%c0_53, %c1_54, %c4_55, %c0_56], %83 {strides = array<i32>} : memref<1x3x8x256xf32, #tpu.memory_space<vmem>>, vector<1x1x1x256xf32>,
    %c0_57 = arith.constant 0 : index
    %c1_58 = arith.constant 1 : index
    %c5_59 = arith.constant 5 : index
    %c0_60 = arith.constant 0 : index
    %84 = vector.load %arg2[%c0_57, %c1_58, %c5_59, %c0_60] : memref<1x3x85x256xf32, #tpu.memory_space<vmem>>, vector<1x1x80x256xf32>
    %85 = vector.shape_cast %84 : vector<1x1x80x256xf32> to vector<80x256xf32>
    %cst_61 = arith.constant dense<0xFF800000> : vector<256xf32>
    %86 = vector.multi_reduction <maximumf>, %85, %cst_61 [0] : vector<80x256xf32> to vector<256xf32>
    %87 = vector.shape_cast %86 : vector<256xf32> to vector<1x256xf32>
    %88 = tpu.iota {dimensions = array<i32: 0>} : vector<80x256xi32>
    %89 = vector.broadcast %87 : vector<1x256xf32> to vector<80x256xf32>
    %90 = arith.cmpf oge, %85, %89 : vector<80x256xf32>
    %c80_i32_62 = arith.constant 80 : i32
    %91 = vector.broadcast %c80_i32_62 : i32 to vector<80x256xi32>
    %92 = arith.select %90, %88, %91 : vector<80x256xi1>, vector<80x256xi32>
    %cst_63 = arith.constant dense<2147483647> : vector<256xi32>
    %93 = vector.multi_reduction <minsi>, %92, %cst_63 [0] : vector<80x256xi32> to vector<256xi32>
    %94 = vector.shape_cast %93 : vector<256xi32> to vector<1x256xi32>
    %95 = arith.sitofp %94 : vector<1x256xi32> to vector<1x256xf32>
    %c0_64 = arith.constant 0 : index
    %c1_65 = arith.constant 1 : index
    %c5_66 = arith.constant 5 : index
    %c0_67 = arith.constant 0 : index
    %96 = vector.load %arg3[%c0_64, %c1_65, %c5_66, %c0_67] : memref<1x3x8x256xf32, #tpu.memory_space<vmem>>, vector<1x1x1x256xf32>
    %97 = vector.shape_cast %96 : vector<1x1x1x256xf32> to vector<1x256xf32>
    %98 = vector.shape_cast %95 : vector<1x256xf32> to vector<1x1x1x256xf32>
    tpu.vector_store %arg3[%c0_64, %c1_65, %c5_66, %c0_67], %98 {strides = array<i32>} : memref<1x3x8x256xf32, #tpu.memory_space<vmem>>, vector<1x1x1x256xf32>,
    %c0_68 = arith.constant 0 : index
    %c1_69 = arith.constant 1 : index
    %c6_70 = arith.constant 6 : index
    %c0_71 = arith.constant 0 : index
    %99 = vector.load %arg3[%c0_68, %c1_69, %c6_70, %c0_71] : memref<1x3x8x256xf32, #tpu.memory_space<vmem>>, vector<1x1x2x256xf32>
    %100 = vector.shape_cast %99 : vector<1x1x2x256xf32> to vector<2x256xf32>
    %101 = vector.shape_cast %1 : vector<2x256xf32> to vector<1x1x2x256xf32>
    tpu.vector_store %arg3[%c0_68, %c1_69, %c6_70, %c0_71], %101 {strides = array<i32>} : memref<1x3x8x256xf32, #tpu.memory_space<vmem>>, vector<1x1x2x256xf32>,
    %c0_72 = arith.constant 0 : index
    %c2_73 = arith.constant 2 : index
    %c0_74 = arith.constant 0 : index
    %c0_75 = arith.constant 0 : index
    %102 = vector.load %arg2[%c0_72, %c2_73, %c0_74, %c0_75] : memref<1x3x85x256xf32, #tpu.memory_space<vmem>>, vector<1x1x5x256xf32>
    %103 = vector.shape_cast %102 : vector<1x1x5x256xf32> to vector<5x256xf32>
    %104 = arith.negf %103 : vector<5x256xf32>
    %105 = math.exp %104 : vector<5x256xf32>
    %cst_76 = arith.constant 1.000000e+00 : f32
    %106 = vector.broadcast %cst_76 : f32 to vector<5x256xf32>
    %107 = arith.addf %106, %105 : vector<5x256xf32>
    %108 = arith.divf %106, %107 : vector<5x256xf32>
    %109 = vector.extract_strided_slice %103 {offsets = [2, 0], sizes = [2, 256], strides = [1, 1]} : vector<5x256xf32> to vector<2x256xf32>
    %110 = math.exp %109 : vector<2x256xf32>
    %111 = vector.extract_strided_slice %108 {offsets = [0, 0], sizes = [2, 256], strides = [1, 1]} : vector<5x256xf32> to vector<2x256xf32>
    %cst_77 = arith.constant 3.800000e+01 : f32
    %112 = vector.broadcast %cst_77 : f32 to vector<2x256xf32>
    %113 = arith.mulf %111, %112 : vector<2x256xf32>
    %114 = arith.addf %113, %0 : vector<2x256xf32>
    %c0_78 = arith.constant 0 : index
    %c2_79 = arith.constant 2 : index
    %c0_80 = arith.constant 0 : index
    %c0_81 = arith.constant 0 : index
    %115 = vector.load %arg3[%c0_78, %c2_79, %c0_80, %c0_81] : memref<1x3x8x256xf32, #tpu.memory_space<vmem>>, vector<1x1x2x256xf32>
    %116 = vector.shape_cast %115 : vector<1x1x2x256xf32> to vector<2x256xf32>
    %117 = vector.shape_cast %114 : vector<2x256xf32> to vector<1x1x2x256xf32>
    tpu.vector_store %arg3[%c0_78, %c2_79, %c0_80, %c0_81], %117 {strides = array<i32>} : memref<1x3x8x256xf32, #tpu.memory_space<vmem>>, vector<1x1x2x256xf32>,
    %118 = vector.extract_strided_slice %110 {offsets = [0, 0], sizes = [1, 256], strides = [1, 1]} : vector<2x256xf32> to vector<1x256xf32>
    %cst_82 = arith.constant 3.730000e+02 : f32
    %119 = vector.broadcast %cst_82 : f32 to vector<1x256xf32>
    %120 = arith.mulf %118, %119 : vector<1x256xf32>
    %c0_83 = arith.constant 0 : index
    %c2_84 = arith.constant 2 : index
    %c2_85 = arith.constant 2 : index
    %c0_86 = arith.constant 0 : index
    %121 = vector.load %arg3[%c0_83, %c2_84, %c2_85, %c0_86] : memref<1x3x8x256xf32, #tpu.memory_space<vmem>>, vector<1x1x1x256xf32>
    %122 = vector.shape_cast %121 : vector<1x1x1x256xf32> to vector<1x256xf32>
    %123 = vector.shape_cast %120 : vector<1x256xf32> to vector<1x1x1x256xf32>
    tpu.vector_store %arg3[%c0_83, %c2_84, %c2_85, %c0_86], %123 {strides = array<i32>} : memref<1x3x8x256xf32, #tpu.memory_space<vmem>>, vector<1x1x1x256xf32>,
    %124 = vector.extract_strided_slice %110 {offsets = [1, 0], sizes = [1, 256], strides = [1, 1]} : vector<2x256xf32> to vector<1x256xf32>
    %cst_87 = arith.constant 3.260000e+02 : f32
    %125 = vector.broadcast %cst_87 : f32 to vector<1x256xf32>
    %126 = arith.mulf %124, %125 : vector<1x256xf32>
    %c0_88 = arith.constant 0 : index
    %c2_89 = arith.constant 2 : index
    %c3_90 = arith.constant 3 : index
    %c0_91 = arith.constant 0 : index
    %127 = vector.load %arg3[%c0_88, %c2_89, %c3_90, %c0_91] : memref<1x3x8x256xf32, #tpu.memory_space<vmem>>, vector<1x1x1x256xf32>
    %128 = vector.shape_cast %127 : vector<1x1x1x256xf32> to vector<1x256xf32>
    %129 = vector.shape_cast %126 : vector<1x256xf32> to vector<1x1x1x256xf32>
    tpu.vector_store %arg3[%c0_88, %c2_89, %c3_90, %c0_91], %129 {strides = array<i32>} : memref<1x3x8x256xf32, #tpu.memory_space<vmem>>, vector<1x1x1x256xf32>,
    %130 = vector.extract_strided_slice %108 {offsets = [4, 0], sizes = [1, 256], strides = [1, 1]} : vector<5x256xf32> to vector<1x256xf32>
    %c0_92 = arith.constant 0 : index
    %c2_93 = arith.constant 2 : index
    %c4_94 = arith.constant 4 : index
    %c0_95 = arith.constant 0 : index
    %131 = vector.load %arg3[%c0_92, %c2_93, %c4_94, %c0_95] : memref<1x3x8x256xf32, #tpu.memory_space<vmem>>, vector<1x1x1x256xf32>
    %132 = vector.shape_cast %131 : vector<1x1x1x256xf32> to vector<1x256xf32>
    %133 = vector.shape_cast %130 : vector<1x256xf32> to vector<1x1x1x256xf32>
    tpu.vector_store %arg3[%c0_92, %c2_93, %c4_94, %c0_95], %133 {strides = array<i32>} : memref<1x3x8x256xf32, #tpu.memory_space<vmem>>, vector<1x1x1x256xf32>,
    %c0_96 = arith.constant 0 : index
    %c2_97 = arith.constant 2 : index
    %c5_98 = arith.constant 5 : index
    %c0_99 = arith.constant 0 : index
    %134 = vector.load %arg2[%c0_96, %c2_97, %c5_98, %c0_99] : memref<1x3x85x256xf32, #tpu.memory_space<vmem>>, vector<1x1x80x256xf32>
    %135 = vector.shape_cast %134 : vector<1x1x80x256xf32> to vector<80x256xf32>
    %cst_100 = arith.constant dense<0xFF800000> : vector<256xf32>
    %136 = vector.multi_reduction <maximumf>, %135, %cst_100 [0] : vector<80x256xf32> to vector<256xf32>
    %137 = vector.shape_cast %136 : vector<256xf32> to vector<1x256xf32>
    %138 = tpu.iota {dimensions = array<i32: 0>} : vector<80x256xi32>
    %139 = vector.broadcast %137 : vector<1x256xf32> to vector<80x256xf32>
    %140 = arith.cmpf oge, %135, %139 : vector<80x256xf32>
    %c80_i32_101 = arith.constant 80 : i32
    %141 = vector.broadcast %c80_i32_101 : i32 to vector<80x256xi32>
    %142 = arith.select %140, %138, %141 : vector<80x256xi1>, vector<80x256xi32>
    %cst_102 = arith.constant dense<2147483647> : vector<256xi32>
    %143 = vector.multi_reduction <minsi>, %142, %cst_102 [0] : vector<80x256xi32> to vector<256xi32>
    %144 = vector.shape_cast %143 : vector<256xi32> to vector<1x256xi32>
    %145 = arith.sitofp %144 : vector<1x256xi32> to vector<1x256xf32>
    %c0_103 = arith.constant 0 : index
    %c2_104 = arith.constant 2 : index
    %c5_105 = arith.constant 5 : index
    %c0_106 = arith.constant 0 : index
    %146 = vector.load %arg3[%c0_103, %c2_104, %c5_105, %c0_106] : memref<1x3x8x256xf32, #tpu.memory_space<vmem>>, vector<1x1x1x256xf32>
    %147 = vector.shape_cast %146 : vector<1x1x1x256xf32> to vector<1x256xf32>
    %148 = vector.shape_cast %145 : vector<1x256xf32> to vector<1x1x1x256xf32>
    tpu.vector_store %arg3[%c0_103, %c2_104, %c5_105, %c0_106], %148 {strides = array<i32>} : memref<1x3x8x256xf32, #tpu.memory_space<vmem>>, vector<1x1x1x256xf32>,
    %c0_107 = arith.constant 0 : index
    %c2_108 = arith.constant 2 : index
    %c6_109 = arith.constant 6 : index
    %c0_110 = arith.constant 0 : index
    %149 = vector.load %arg3[%c0_107, %c2_108, %c6_109, %c0_110] : memref<1x3x8x256xf32, #tpu.memory_space<vmem>>, vector<1x1x2x256xf32>
    %150 = vector.shape_cast %149 : vector<1x1x2x256xf32> to vector<2x256xf32>
    %151 = vector.shape_cast %1 : vector<2x256xf32> to vector<1x1x2x256xf32>
    tpu.vector_store %arg3[%c0_107, %c2_108, %c6_109, %c0_110], %151 {strides = array<i32>} : memref<1x3x8x256xf32, #tpu.memory_space<vmem>>, vector<1x1x2x256xf32>,
    return
  }
  func.func @transform_0(%arg0: i32) -> (i32, i32) {
    %c0_i32 = arith.constant 0 : i32
    %c0_i32_0 = arith.constant 0 : i32
    %c0_i32_1 = arith.constant 0 : i32
    return %c0_i32, %c0_i32_0 : i32, i32
  }
  func.func @transform_1(%arg0: i32) -> (i32, i32, i32, i32) {
    %c0_i32 = arith.constant 0 : i32
    %c0_i32_0 = arith.constant 0 : i32
    %c0_i32_1 = arith.constant 0 : i32
    %c0_i32_2 = arith.constant 0 : i32
    return %arg0, %c0_i32, %c0_i32_0, %c0_i32_1 : i32, i32, i32, i32
  }
  func.func @transform_2(%arg0: i32) -> (i32, i32, i32, i32) {
    %c0_i32 = arith.constant 0 : i32
    %c0_i32_0 = arith.constant 0 : i32
    %c0_i32_1 = arith.constant 0 : i32
    %c0_i32_2 = arith.constant 0 : i32
    return %arg0, %c0_i32, %c0_i32_0, %c0_i32_1 : i32, i32, i32, i32
  }
}

</mosaic_0001>

<bundles_post_ra>
// kernel: tpu_custom_call.1
= control target key start
LH: loop header
LB: loop body
LE: loop exit
PB: predicated region body
PF: predicated region fallthrough
CT: control target
= control target key end

     0   :  { %7 = vsyncpa [#allocation3], 0  ;;  %s2226_s0 = inlined_call_operand.vmem [shape: f32[2,256], index: 0, kind: input, shape index: {}]   ;;  %s2227_s1 = inlined_call_operand.vmem [shape: f32[2,3,85,256], index: 1, kind: input, shape index: {}]   ;;  %s2228_s2 = inlined_call_operand.hbm [shape: f32[2,3,8,256], index: 2, kind: output, shape index: {}]  }
   0x1   :  { %9 = vsyncpa [#allocation3 + $0x1], 0  ;;  %s1377_s9 = smov 0   ;;  %s1379_s10 = smov 0  }
   0x2   :  { %s1381_s11 = smov 0   ;;  %s1383_s12 = smov 0  }
   0x3 LB: > { %s1398_s13 = sadd.s32 4294967295, %s1355_s12   ;;  %s1127_s14 = sadd.s32 4294967294, %s1355_s12   ;;  %s1355_s12 = sphi %s1383_s12, %s2299_s12   ;;  %s1351_s11 = sphi %s1381_s11, %s2298_s11   ;;  %s1347_s10 = sphi %s1379_s10, %s2297_s10   ;;  %s1343_s9 = sphi %s1377_s9, %s2296_s9  }
   0x4   : > { %s1402_s15 = sadd.s32 1, %s1355_s12   ;;  %s69_s16 = sadd.s32 1, %s1351_s11 }
   0x5   : > { %s66_s17 = ssub.s32 %s1355_s12, %s1402_s15  ;;  %p79_p0 = scmp.ne.s32.totalorder %s1351_s11, %s1347_s10 }
   0x6   : > { %p67_p1 = scmp.eq.s32.totalorder %s66_s17, 0  ;;  %p80_p2 = scmp.eq.s32.totalorder %s1398_s13, 1 }
   0x7   : > { %p85_p3 = scmp.ne.s32.totalorder %s1347_s10, %s1343_s9  ;;  %p86_p4 = scmp.eq.s32.totalorder %s1127_s14, 1 }
   0x8   : > { %s1413_s18 = scalar_select %p67_p1, %s1351_s11, %s69_s16  }
   0x9   : > { %p1415_p5 = por %p80_p2, %p79_p0  ;;  %p1419_p6 = por %p86_p4, %p85_p3 }
   0xa   : > { %p1130_p7 = scmp.ge.s32.totalorder %s1355_s12, 1  ;;  %p115_p8 = scmp.lt.s32.totalorder %s1355_s12, 3 }
   0xc   : > { %p116_p9 = pnand %p1130_p7, %p115_p8 }
   0xe   : > { %119 = sbr.rel (%p116_p9) target bundleno = 209 (0xd1), region = 28 }
  0x15   : > { %s134_s21 = sand.u32 1, %s1347_s10   ;;  %p137_p10 = scmp.lt.s32.totalorder %s1398_s13, 1  ;;  %v186_v0 = vlaneseq  ;;  %v1357_v1 = vmov 1966171168   ;;  %vm2243_vm0 = vcmask 1047557   ;;  %vm2242_vm1 = vcmask 1044480  }
  0x16   : > { %s1210_s22 = smul.u32 48, %s134_s21  ;;  %v184_v2 = vunpack.c.l.s4 %v1357_v1  ;;  %v1434_v4 = vld.sshfl [vmem:[%s2226_s0] sm:$0x33 pattern:$0x76325410]  ;;  %v1358_v8 = vmov 0.0  }
  0x17   : > { %s138_s23 = scalar_select %p137_p10, %s1398_s13, 1  ;;  %v187_v3 = vshrl.u32 %v186_v0, 7  ;;  %v1476_v24 = vcombine.high %v1434_v4, %v1434_v4  ;;  %vm1612_vm2 = vcmp.lt.s32.totalorder %v186_v0, 256 }
  0x18   : > { %v185_v5 = vunpack.c.0.s8 %v184_v2  ;;  %s1440_s27 = scalar_lea.vmem [#allocation2], %s1210_s22  ;;  %s1212_s5 = smul.u32 768, %s1398_s13 }
  0x19   : > { %s1211_s24 = smul.u32 528, %s138_s23  ;;  %v1436_v6 = vadd.s32 8, %v187_v3  ;;  %v1438_v7 = vadd.s32 16, %v187_v3  ;;  %471 = vst [vmem:[%s1440_s27] sm:$0xc0] %v1358_v8  ;;  %472 = vst [vmem:[%s1440_s27 + $0x8] sm:$0xc0] %v1358_v8 }
  0x1a   : > { %1171 = vst [vmem:[%s1440_s27 + $0x10] sm:$0xc0] %v1358_v8  ;;  %1172 = vst [vmem:[%s1440_s27 + $0x18] sm:$0xc0] %v1358_v8  ;;  %v1448_v9 = vadd.s32 24, %v187_v3  ;;  %v1450_v10 = vadd.s32 32, %v187_v3  ;;  %v1478_v25 = vsub.s32 %v185_v5, %v187_v3  ;;  %s2175_s14 = scalar_lea.hbm %s2228_s2, %s1212_s5 }
  0x1b   : > { %1205 = vst [vmem:[%s1440_s27 + $0x20] sm:$0xc0] %v1358_v8  ;;  %1206 = vst [vmem:[%s1440_s27 + $0x28] sm:$0xc0] %v1358_v8  ;;  %v1452_v11 = vadd.s32 40, %v187_v3  ;;  %v1454_v12 = vadd.s32 48, %v187_v3  ;;  %s1459_s30 = scalar_lea.vmem %s2227_s1, %s1211_s24 }
  0x1c   : > { %v1461_v13 = vadd.s32 56, %v187_v3  ;;  %v1463_v14 = vadd.s32 64, %v187_v3  ;;  %v1465_v15 = vadd.s32 72, %v187_v3  ;;  %v1467_v16 = vrot.slane %v187_v3, 3  ;;  %v143_v17 = vld [vmem:[%s1459_s30] sm:$0x1f] }
  0x1d   : > { %v144_v18 = vld [vmem:[%s1459_s30 + $0x8] sm:$0x1f]  ;;  %v1472_v19 = vld [vmem:[%s1459_s30] sm:$0xe0]  ;;  %v1132_v20 = vmul.f32 -1.442695, %v143_v17 }
  0x1e   : > { %v157_v21 = vmul.f32 1.442695, %v143_v17  ;;  %v1133_v22 = vmul.f32 -1.442695, %v144_v18  ;;  %v159_v23 = vmul.f32 1.442695, %v144_v18 }
  0x1f   : > { %v1481_v26 = vld [vmem:[%s1459_s30 + $0x8] sm:$0xe0]  ;;  %v1484_v27 = vld [vmem:[%s1459_s30 + $0x10] sm:$0xff]  ;;  %v1487_v28 = vld [vmem:[%s1459_s30 + $0x18] sm:$0xff]  ;;  %1256 = vpow2.f32 %v1132_v20  ;;  %v275_v32 = vsel %vm2243_vm0, %v1472_v19, -inf  ;;  %v346_v34 = vrot.slane %v1436_v6, 3 }
  0x20   : > { %v1490_v29 = vld [vmem:[%s1459_s30 + $0x20] sm:$0xff]  ;;  %v1493_v30 = vld [vmem:[%s1459_s30 + $0x28] sm:$0xff]  ;;  %v1496_v31 = vld [vmem:[%s1459_s30 + $0x30] sm:$0xff]  ;;  %v294_v33 = vsel %vm2243_vm0, %v1481_v26, -inf  ;;  %1258 = vpow2.f32 %v157_v21  ;;  %v348_v46 = vrot.slane %v1438_v7, 3  ;;  %v350_v58 = vrot.slane %v1448_v9, 3 }
  0x21   : > { %v1504_v35 = vld [vmem:[%s1459_s30 + $0x38] sm:$0xff]  ;;  %v1507_v36 = vld [vmem:[%s1459_s30 + $0x40] sm:$0xff]  ;;  %v1510_v37 = vld [vmem:[%s1459_s30 + $0x48] sm:$0xff]  ;;  %v276_v38 = vmax.f32 %v275_v32, %v1490_v29  ;;  %v277_v39 = vmax.f32 %v1484_v27, %v1496_v31  ;;  %v295_v40 = vmax.f32 %v294_v33, %v1493_v30  ;;  %1260 = vpow2.f32 %v1133_v22  ;;  %s1057_s6 = sshll.u32 %s1440_s27, 4  ;;  %s2185_s13 = scalar_lea.sflag [#allocation3], %s134_s21  ;;  %s2177_s6 = int_to_ptr.vmem [resolvable:$true] %s1057_s6 }
  0x22   : > { %v1517_v41 = vld [vmem:[%s1459_s30 + $0x50] sm:$0xff]  ;;  %v1520_v42 = vld [vmem:[%s1459_s30 + $0x58] sm:$0xff]  ;;  %v1523_v43 = vld [vmem:[%s1459_s30 + $0x60] sm:$0xff]  ;;  %v296_v44 = vmax.f32 %v1487_v28, %v1504_v35  ;;  %v1529_v45 = vsel %vm2242_vm1, %v1467_v16, %v346_v34  ;;  %1262 = vpow2.f32 %v159_v23  ;;  %v1555_v57 = vsel %vm2242_vm1, %v346_v34, %v348_v46  ;;  %s1293_s16 = scalar_lea.vmem %s2177_s6, 768  ;;  %s1359_s17 = smov [#allocation2]  }
  0x23   : > { %v1533_v47 = vld [vmem:[%s1459_s30 + $0x68] sm:$0xff]  ;;  %v1536_v48 = vld [vmem:[%s1459_s30 + $0x70] sm:$0xff]  ;;  %v1539_v49 = vld [vmem:[%s1459_s30 + $0x78] sm:$0xff]  ;;  %v278_v50 = vmax.f32 %v276_v38, %v1507_v36  ;;  %v279_v51 = vmax.f32 %v277_v39, %v1517_v41  ;;  %v297_v52 = vmax.f32 %v295_v40, %v1510_v37  ;;  %v352_v59 = vrot.slane %v1450_v10, 3  ;;  %p1294_p11 = scmp.ne.s32.totalorder %s2177_s6, %s1293_s16  ;;  %s1297_s22 = sshll.u32 %s1359_s17, 4  ;;  %s1298_s22 = int_to_ptr.vmem [resolvable:$false] %s1297_s22 }
  0x24   : > { %v1545_v53 = vld [vmem:[%s1459_s30 + $0x80] sm:$0xff]  ;;  %v1548_v54 = vld [vmem:[%s1459_s30 + $0x88] sm:$0xff]  ;;  %v1551_v55 = vld [vmem:[%s1459_s30 + $0x90] sm:$0xff]  ;;  %v298_v56 = vmax.f32 %v296_v44, %v1520_v42  ;;  %v354_v3 = vrot.slane %v1452_v11, 3  ;;  %v1578_v8 = vsel %vm2242_vm1, %v348_v46, %v350_v58  ;;  %v356_v22 = vrot.slane %v1454_v12, 3  ;;  %s1299_s23 = scalar_lea.vmem %s1298_s22, 1536  ;;  %p1300_p0 = scmp.lt.s32.totalorder %s2177_s6, %s1298_s22 }
  0x25   : > { %v1560_v60 = vld [vmem:[%s1459_s30 + $0x98] sm:$0xff]  ;;  %v1563_v61 = vld [vmem:[%s1459_s30 + $0xa0] sm:$0x1f]  ;;  %v1566_v62 = vld [vmem:[%s1459_s30 + $0xa8] sm:$0x1f]  ;;  %v280_v63 = vmax.f32 %v278_v50, %v1523_v43  ;;  %v281_v1 = vmax.f32 %v279_v51, %v1536_v48  ;;  %v299_v2 = vmax.f32 %v297_v52, %v1533_v47  ;;  %v1584_v18 = vsel %vm2242_vm1, %v350_v58, %v352_v59  ;;  %p1295_p12 = pnand %p1294_p11, %p1415_p5  ;;  %p1301_p1 = scmp.lt.s32.totalorder %s1299_s23, %s1293_s16 }
  0x26   : > { %v285_v5 = vsel %vm2242_vm1, %v1563_v61, -inf  ;;  %v300_v6 = vmax.f32 %v298_v56, %v1539_v49  ;;  %v303_v7 = vsel %vm2242_vm1, %v1566_v62, -inf  ;;  %v1139_v11 = vld [vmem:[%s1459_s30 + $0xb0] sm:$0x1f]  ;;  %v1589_v21 = vsel %vm2242_vm1, %v352_v59, %v354_v3 }
  0x27   : > { %v282_v9 = vmax.f32 %v280_v63, %v1545_v53  ;;  %v283_v10 = vmax.f32 %v281_v1, %v1551_v55  ;;  %v301_v17 = vmax.f32 %v299_v2, %v1548_v54  ;;  %v358_v23 = vrot.slane %v1461_v13, 3  ;;  %p1296_p13 = pneg %p1295_p12  ;;  %p1302_p2 = por %p1301_p1, %p1300_p0 }
  0x28   : > { %v302_v20 = vmax.f32 %v300_v6, %v1560_v60  ;;  %v360_v34 = vrot.slane %v1463_v14, 3  ;;  %v1595_v38 = vrot.slane %v1465_v15, 3  ;;  %v1598_v40 = vsel %vm2242_vm1, %v354_v3, %v356_v22  ;;  %v1140_v14 = vld [vmem:[%s1459_s30 + $0xb8] sm:$0x1f] }
  0x29   : > { %v286_v32 = vmax.f32 %v282_v9, %v285_v5  ;;  %v304_v33 = vmax.f32 %v301_v17, %v303_v7  ;;  %v1257_v39 = vpop.eup %1256  ;;  %v1601_v44 = vsel %vm2242_vm1, %v356_v22, %v358_v23  ;;  %v1141_v46 = vmul.f32 -1.442695, %v1139_v11  ;;  %v1617_v7 = vld [vmem:[%s1459_s30 + $0xb0] sm:$0xe0]  ;;  %p1303_p3 = pnand %p1302_p2, %p1296_p13 }
  0x2a   : > { %2246 = vst [vmem:[#allocation5_spill] sm:$0xff] %v1595_v38  ;;  %v488_v50 = vmul.f32 1.442695, %v1139_v11  ;;  %v1259_v12 = vpop.eup %1258  ;;  %v151_v51 = vadd.f32 1.0, %v1257_v39  ;;  %v1604_v56 = vsel %vm2242_vm1, %v358_v23, %v360_v34  ;;  %v1609_v63 = vsel %vm2242_vm1, %v360_v34, %v1595_v38  ;;  %2249 = vst [vmem:[#allocation6_spill] sm:$0xff] %v1617_v7  ;;  %v1620_v11 = vld [vmem:[%s1459_s30 + $0xd0] sm:$0xff] }
  0x2b   : > { %v287_v13 = vmax.f32 %v286_v32, %v283_v10  ;;  %v305_v52 = vmax.f32 %v304_v33, %v302_v20  ;;  %v1261_v15 = vpop.eup %1260  ;;  %v178_v58 = vmul.f32 116.0, %v1259_v12  ;;  %v206_v59 = vmul.f32 90.0, %v1259_v12  ;;  %2250 = vst [vmem:[#allocation7_spill] sm:$0xff] %v1620_v11  ;;  %v1623_v23 = vld [vmem:[%s1459_s30 + $0xc0] sm:$0xff]  ;;  %v1629_v33 = vld [vmem:[%s1459_s30 + $0x150] sm:$0x1f] }
  0x2c   : > { %1264 = vpow2.f32 %v1141_v46  ;;  %v1263_v1 = vpop.eup %1262  ;;  %v152_v2 = vadd.f32 1.0, %v1261_v15  ;;  %v1142_v17 = vmul.f32 -1.442695, %v1140_v14  ;;  %v490_v22 = vmul.f32 1.442695, %v1140_v14  ;;  %2251 = vst [vmem:[#allocation8_spill] sm:$0xff] %v1623_v23 }
  0x2d   : > { %1266 = vrcp.f32 %v151_v51  ;;  %v288_v5 = vrot.slane %v287_v13, 4  ;;  %v306_v6 = vrot.slane %v305_v52, 4  ;;  %v179_v9 = vmul.f32 116.0, %v1263_v1  ;;  %v1626_v32 = vld [vmem:[%s1459_s30 + $0xe0] sm:$0xff]  ;;  %2253 = vst [vmem:[#allocation10_spill] sm:$0xff] %v1629_v33 }
  0x2e   : > { %v207_v10 = vmul.f32 90.0, %v1263_v1  ;;  %1268 = vpow2.f32 %v488_v50  ;;  %2252 = vst [vmem:[#allocation9_spill] sm:$0xff] %v1626_v32  ;;  %v1632_v46 = vld [vmem:[%s1459_s30 + $0xb8] sm:$0xe0]  ;;  %v1635_v50 = vld [vmem:[%s1459_s30 + $0xf0] sm:$0xff]  ;;  %v591_v12 = vsel %vm2243_vm0, %v1617_v7, -inf }
  0x2f   : > { %1270 = vrcp.f32 %v152_v2  ;;  %v289_v20 = vmax.f32 %v287_v13, %v288_v5  ;;  %v307_v0 = vmax.f32 %v305_v52, %v306_v6  ;;  %v182_v34 = vcombine.low %v178_v58, %v179_v9  ;;  %2254 = vst [vmem:[#allocation11_spill] sm:$0xff] %v1632_v46  ;;  %2255 = vst [vmem:[#allocation12_spill] sm:$0xff] %v1635_v50  ;;  %v1640_v52 = vld [vmem:[%s1459_s30 + $0xd8] sm:$0xff]  ;;  %v1643_v14 = vld [vmem:[%s1459_s30 + $0x100] sm:$0xff] }
  0x30   : > { %v210_v39 = vcombine.low %v206_v59, %v207_v10  ;;  %1272 = vpow2.f32 %v1142_v17  ;;  %2256 = vst [vmem:[#allocation13_spill] sm:$0xff] %v1640_v52  ;;  %2257 = vst [vmem:[#allocation14_spill] sm:$0xff] %v1643_v14  ;;  %v592_v15 = vmax.f32 %v591_v12, %v1620_v11  ;;  %v1649_v1 = vld [vmem:[%s1459_s30 + $0xc8] sm:$0xff]  ;;  %v1655_v5 = vld [vmem:[%s1459_s30 + $0x110] sm:$0xff]  ;;  %v593_v6 = vmax.f32 %v1623_v23, %v1626_v32 }
  0x31   : > { %v290_v51 = vrot.slane %v289_v20, 2  ;;  %v308_v13 = vrot.slane %v307_v0, 2  ;;  %1274 = vpow2.f32 %v490_v22  ;;  %v189_v58 = vrot.slane %v182_v34, %v1478_v25  ;;  %v1652_v2 = vld [vmem:[%s1459_s30 + $0xe8] sm:$0xff]  ;;  %v1664_v22 = vld [vmem:[%s1459_s30 + $0xf8] sm:$0xff]  ;;  %v1667_v34 = vld [vmem:[%s1459_s30 + $0x120] sm:$0xff] }
  0x32   : > { %v217_v59 = vrot.slane %v210_v39, %v1478_v25  ;;  %2258 = vst [vmem:[#allocation15_spill] sm:$0xff] %v1652_v2  ;;  %v1661_v9 = vsel %vm2242_vm1, %v1629_v33, -inf  ;;  %v594_v39 = vmax.f32 %v592_v15, %v1635_v50  ;;  %v609_v12 = vsel %vm2243_vm0, %v1632_v46, -inf  ;;  %v1674_v32 = vld [vmem:[%s1459_s30 + $0x130] sm:$0xff] }
  0x33   : > { %2259 = vst [vmem:[#allocation16_spill] sm:$0xff] %v1661_v9  ;;  %v291_v10 = vmax.f32 %v289_v20, %v290_v51  ;;  %v309_v17 = vmax.f32 %v307_v0, %v308_v13  ;;  %v196_v11 = vrot.slane %v189_v58, %v1478_v25  ;;  %v595_v23 = vmax.f32 %v593_v6, %v1643_v14  ;;  %v1679_v51 = vld [vmem:[%s1459_s30 + $0x108] sm:$0xff]  ;;  %v1682_v13 = vld [vmem:[%s1459_s30 + $0x140] sm:$0xff] }
  0x34   : > { %v218_v7 = vcombine.high %v217_v59, %v217_v59  ;;  %v610_v33 = vmax.f32 %v609_v12, %v1640_v52  ;;  %v596_v15 = vmax.f32 %v594_v39, %v1655_v5  ;;  %v611_v46 = vmax.f32 %v1649_v1, %v1652_v2 }
  0x35   : > { %v292_v20 = vrot.slane %v291_v10, 1  ;;  %v310_v0 = vrot.slane %v309_v17, 1  ;;  %v197_v59 = vcombine.high %v196_v11, %v196_v11  ;;  %v597_v6 = vmax.f32 %v595_v23, %v1667_v34 }
  0x36   : > { %v1265_v58 = vpop.eup %1264  ;;  %v225_v50 = vrot.slane %v218_v7, %v1478_v25  ;;  %v1690_v12 = vmax.f32 %v610_v33, %v1664_v22  ;;  %v1699_v39 = vmax.f32 %v596_v15, %v1674_v32  ;;  %v1710_v33 = vmax.f32 %v611_v46, %v1679_v51 }
  0x37   : > { %v1267_v52 = vpop.eup %1266  ;;  %v1692_v14 = vmax.f32 %v291_v10, %v292_v20  ;;  %v1694_v9 = vmax.f32 %v309_v17, %v310_v0  ;;  %v1696_v38 = vadd.f32 1.0, %v1265_v58  ;;  %1135 = vst.msk [vmem:[%s1440_s27 + $0x2] ss:$8 sm:$0x3] %vm1612_vm2, %v197_v59  ;;  %v1707_v23 = vmax.f32 %v597_v6, %v1682_v13 }
  0x38   : > { %v1701_v2 = vpop.eup %1268  ;;  %v161_v11 = vmul.f32 38.0, %v1267_v52  ;;  %v226_v7 = vcombine.high %v225_v50, %v225_v50 }
  0x39   : > { %v1271_v10 = vpop.eup %1270  ;;  %vm323_vm3 = vcmp.ge.f32.partialorder %v1472_v19, %v1692_v14  ;;  %vm324_vm4 = vcmp.ge.f32.partialorder %v1481_v26, %v1694_v9  ;;  %vm325_vm5 = vcmp.ge.f32.partialorder %v1484_v27, %v1692_v14  ;;  %vm326_vm6 = vcmp.ge.f32.partialorder %v1487_v28, %v1694_v9 }
  0x3a   : > { %v1720_v50 = vpop.eup %1272  ;;  %v174_v17 = vadd.f32 %v1434_v4, %v161_v11  ;;  %v162_v46 = vmul.f32 38.0, %v1271_v10  ;;  %1136 = vst.msk [vmem:[%s1440_s27 + $0x3] ss:$8 sm:$0x3] %vm1612_vm2, %v226_v7  ;;  %v233_v20 = vcombine.high %v1267_v52, %v1271_v10  ;;  %vm327_vm7 = vcmp.ge.f32.partialorder %v1490_v29, %v1692_v14  ;;  %v2267_v10 = vld [vmem:[#allocation5_spill] sm:$0xff] }
  0x3b   : > { %v1728_v0 = vpop.eup %1274  ;;  %vm328_vm8 = vcmp.ge.f32.partialorder %v1493_v30, %v1694_v9  ;;  %vm329_vm9 = vcmp.ge.f32.partialorder %v1496_v31, %v1692_v14  ;;  %vm330_vm10 = vcmp.ge.f32.partialorder %v1504_v35, %v1694_v9  ;;  %vm338_vm12 = vcmp.ge.f32.partialorder %v1539_v49, %v1694_v9 }
  0x3c   : > { %176 = vst [vmem:[%s1440_s27] sm:$0x3] %v174_v17  ;;  %v175_v52 = vadd.f32 %v1476_v24, %v162_v46  ;;  %v240_v15 = vrot.slane %v233_v20, %v1478_v25  ;;  %vm339_vm13 = vcmp.ge.f32.partialorder %v1545_v53, %v1692_v14  ;;  %vm340_vm14 = vcmp.ge.f32.partialorder %v1548_v54, %v1694_v9 }
  0x3d   : > { %vm341_vm15 = vcmp.ge.f32.partialorder %v1551_v55, %v1692_v14  ;;  %vm342_vm1 = vcmp.ge.f32.partialorder %v1560_v60, %v1694_v9  ;;  %vm343_vm0 = vcmp.ge.f32.partialorder %v1563_v61, %v1692_v14  ;;  %vm344_vm11 = vcmp.ge.f32.partialorder %v1566_v62, %v1694_v9 }
  0x3e   : > { %177 = vst [vmem:[%s1440_s27 + $0x8] sm:$0x3] %v175_v52  ;;  %v247_v58 = vrot.slane %v240_v15, %v1478_v25  ;;  %v364_v59 = vsel %vm323_vm3, %v1467_v16, 80  ;;  %v365_v6 = vsel %vm324_vm4, %v1467_v16, 80  ;;  %v366_v11 = vsel %vm325_vm5, %v1529_v45, 80 }
  0x3f   : > { %v367_v7 = vsel %vm326_vm6, %v1529_v45, 80  ;;  %v368_v19 = vsel %vm327_vm7, %v1555_v57, 80  ;;  %v369_v26 = vsel %vm328_vm8, %v1555_v57, 80  ;;  %v370_v27 = vsel %vm329_vm9, %v1578_v8, 80 }
  0x40   : > { %1137 = vst.msk [vmem:[%s1440_s27 + $0x4] ss:$8 sm:$0x3] %vm1612_vm2, %v247_v58  ;;  %v371_v28 = vsel %vm330_vm10, %v1578_v8, 80  ;;  %vm2260_vm3 = vcmp.ge.f32.partialorder %v1507_v36, %v1692_v14  ;;  %vm2261_vm4 = vcmp.ge.f32.partialorder %v1510_v37, %v1694_v9  ;;  %vm2262_vm5 = vcmp.ge.f32.partialorder %v1517_v41, %v1692_v14 }
  0x41   : > { %v372_v29 = vsel %vm2260_vm3, %v1584_v18, 80  ;;  %v373_v30 = vsel %vm2261_vm4, %v1584_v18, 80  ;;  %v374_v31 = vsel %vm2262_vm5, %v1589_v21, 80  ;;  %vm2263_vm6 = vcmp.ge.f32.partialorder %v1520_v42, %v1694_v9 }
  0x42   : > { %v375_v35 = vsel %vm2263_vm6, %v1589_v21, 80  ;;  %vm2264_vm7 = vcmp.ge.f32.partialorder %v1523_v43, %v1692_v14  ;;  %vm2265_vm8 = vcmp.ge.f32.partialorder %v1533_v47, %v1694_v9  ;;  %vm2266_vm9 = vcmp.ge.f32.partialorder %v1536_v48, %v1692_v14 }
  0x43   : > { %v376_v36 = vsel %vm2264_vm7, %v1598_v40, 80  ;;  %v377_v37 = vsel %vm2265_vm8, %v1598_v40, 80  ;;  %v378_v41 = vsel %vm2266_vm9, %v1601_v44, 80  ;;  %v379_v42 = vsel %vm338_vm12, %v1601_v44, 80 }
  0x44   : > { %v380_v43 = vsel %vm339_vm13, %v1604_v56, 80  ;;  %v381_v47 = vsel %vm340_vm14, %v1604_v56, 80  ;;  %v382_v48 = vsel %vm341_vm15, %v1609_v63, 80  ;;  %v383_v49 = vsel %vm342_vm1, %v1609_v63, 80 }
  0x45   : > { %v384_v53 = vsel %vm343_vm0, %v2267_v10, 80  ;;  %v385_v54 = vsel %vm344_vm11, %v2267_v10, 80  ;;  %vm2268_vm10 = vcmask 1047557   ;;  %vm389_vm12 = vcmp.lt.s32.totalorder %v366_v11, %v370_v27 }
  0x46   : > { %v386_v17 = vsel %vm2268_vm10, %v364_v59, 2147483647  ;;  %v390_v55 = vsel %vm389_vm12, %v366_v11, %v370_v27  ;;  %vm2269_vm14 = vcmask 1044480   ;;  %vm2270_vm15 = vmmov %vm2268_vm10  ;;  %vm420_vm4 = vcmp.lt.s32.totalorder %v367_v7, %v371_v28 }
  0x47   : > { %vm387_vm13 = vcmp.lt.s32.totalorder %v386_v17, %v368_v19  ;;  %v403_v46 = vsel %vm2269_vm14, %v384_v53, 2147483647  ;;  %v417_v60 = vsel %vm2270_vm15, %v365_v6, 2147483647  ;;  %vm393_vm1 = vcmp.lt.s32.totalorder %v390_v55, %v374_v31  ;;  %v1880_v53 = vld [vmem:[%s1459_s30 + $0x138] sm:$0xff] }
  0x48   : > { %v388_v20 = vsel %vm387_vm13, %v386_v17, %v368_v19  ;;  %vm418_vm3 = vcmp.lt.s32.totalorder %v417_v60, %v369_v26  ;;  %v394_v61 = vsel %vm393_vm1, %v390_v55, %v374_v31  ;;  %v421_v52 = vsel %vm420_vm4, %v367_v7, %v371_v28 }
  0x49   : > { %vm391_vm5 = vcmp.lt.s32.totalorder %v388_v20, %v372_v29  ;;  %v419_v14 = vsel %vm418_vm3, %v417_v60, %v369_v26  ;;  %vm397_vm0 = vcmp.lt.s32.totalorder %v394_v61, %v378_v41  ;;  %vm424_vm6 = vcmp.lt.s32.totalorder %v421_v52, %v375_v35 }
  0x4a   : > { %v392_v15 = vsel %vm391_vm5, %v388_v20, %v372_v29  ;;  %vm422_vm11 = vcmp.lt.s32.totalorder %v419_v14, %v373_v30  ;;  %v398_v62 = vsel %vm397_vm0, %v394_v61, %v378_v41  ;;  %v425_v58 = vsel %vm424_vm6, %v421_v52, %v375_v35  ;;  %v1870_v41 = vld [vmem:[%s1459_s30 + $0x118] sm:$0xff]  ;;  %v1890_v20 = vld [vmem:[%s1459_s30 + $0x148] sm:$0xff] }
  0x4b   : > { %vm395_vm7 = vcmp.lt.s32.totalorder %v392_v15, %v376_v36  ;;  %v423_v9 = vsel %vm422_vm11, %v419_v14, %v373_v30  ;;  %vm401_vm8 = vcmp.lt.s32.totalorder %v398_v62, %v382_v48  ;;  %vm428_vm10 = vcmp.lt.s32.totalorder %v425_v58, %v379_v42 }
  0x4c   : > { %v396_v59 = vsel %vm395_vm7, %v392_v15, %v376_v36  ;;  %vm426_vm9 = vcmp.lt.s32.totalorder %v423_v9, %v377_v37  ;;  %v402_v6 = vsel %vm401_vm8, %v398_v62, %v382_v48  ;;  %v429_v19 = vsel %vm428_vm10, %v425_v58, %v379_v42  ;;  %v1873_v42 = vld [vmem:[%s1459_s30 + $0x128] sm:$0xff] }
  0x4d   : > { %vm399_vm12 = vcmp.lt.s32.totalorder %v396_v59, %v380_v43  ;;  %v427_v11 = vsel %vm426_vm9, %v423_v9, %v377_v37  ;;  %vm432_vm14 = vcmp.lt.s32.totalorder %v429_v19, %v383_v49  ;;  %vm2271_vm15 = vcmask 1044480  }
  0x4e   : > { %v400_v27 = vsel %vm399_vm12, %v396_v59, %v380_v43  ;;  %vm430_vm13 = vcmp.lt.s32.totalorder %v427_v11, %v381_v47  ;;  %v434_v7 = vsel %vm2271_vm15, %v385_v54, 2147483647  ;;  %v433_v28 = vsel %vm432_vm14, %v429_v19, %v383_v49  ;;  %v2272_v54 = vld [vmem:[#allocation16_spill] sm:$0xff]  ;;  %vm2273_vm11 = vmmov %vm2271_vm15 }
  0x4f   : > { %vm404_vm1 = vcmp.lt.s32.totalorder %v400_v27, %v403_v46  ;;  %v431_v26 = vsel %vm430_vm13, %v427_v11, %v381_v47  ;;  %1276 = vrcp.f32 %v1696_v38  ;;  %v483_v30 = vadd.f32 1.0, %v1720_v50  ;;  %v1877_v50 = vld [vmem:[%s1459_s30 + $0x158] sm:$0x1f] }
  0x50   : > { %v405_v29 = vsel %vm404_vm1, %v400_v27, %v403_v46  ;;  %vm435_vm3 = vcmp.lt.s32.totalorder %v431_v26, %v434_v7  ;;  %v499_v31 = vmul.f32 156.0, %v1701_v2  ;;  %v500_v36 = vmul.f32 156.0, %v1728_v0 }
  0x51   : > { %vm406_vm4 = vcmp.lt.s32.totalorder %v405_v29, %v402_v6  ;;  %v436_v35 = vsel %vm435_vm3, %v431_v26, %v434_v7  ;;  %v523_v37 = vmul.f32 198.0, %v1701_v2  ;;  %1278 = vrcp.f32 %v483_v30  ;;  %v1173_v7 = vld [vmem:[%s1459_s30 + $0x160] sm:$0x1f] }
  0x52   : > { %v407_v43 = vsel %vm406_vm4, %v405_v29, %v402_v6  ;;  %vm437_vm5 = vcmp.lt.s32.totalorder %v436_v35, %v433_v28  ;;  %v524_v38 = vmul.f32 198.0, %v1728_v0  ;;  %v503_v49 = vcombine.low %v499_v31, %v500_v36 }
  0x53   : > { %v408_v47 = vrot.slane %v407_v43, 4  ;;  %v438_v48 = vsel %vm437_vm5, %v436_v35, %v433_v28  ;;  %v601_v2 = vmax.f32 %v1699_v39, %v2272_v54  ;;  %v614_v46 = vmax.f32 %v1690_v12, %v1870_v41 }
  0x54   : > { %v439_v17 = vrot.slane %v438_v48, 4  ;;  %v527_v55 = vcombine.low %v523_v37, %v524_v38  ;;  %v615_v60 = vmax.f32 %v1710_v33, %v1873_v42  ;;  %v510_v0 = vrot.slane %v503_v49, %v1478_v25 }
  0x55   : > { %vm409_vm0 = vcmp.lt.s32.totalorder %v407_v43, %v408_v47  ;;  %v602_v61 = vmax.f32 %v601_v2, %v1707_v23  ;;  %v618_v14 = vsel %vm2273_vm11, %v1877_v50, -inf  ;;  %v616_v12 = vmax.f32 %v614_v46, %v1880_v53 }
  0x56   : > { %v410_v52 = vsel %vm409_vm0, %v407_v43, %v408_v47  ;;  %vm440_vm6 = vcmp.lt.s32.totalorder %v438_v48, %v439_v17  ;;  %v534_v39 = vrot.slane %v527_v55, %v1478_v25  ;;  %v517_v33 = vrot.slane %v510_v0, %v1478_v25 }
  0x57   : > { %v411_v15 = vrot.slane %v410_v52, 2  ;;  %v441_v62 = vsel %vm440_vm6, %v438_v48, %v439_v17  ;;  %v603_v9 = vrot.slane %v602_v61, 4  ;;  %v617_v23 = vmax.f32 %v615_v60, %v1890_v20  ;;  %v1174_v17 = vld [vmem:[%s1459_s30 + $0x168] sm:$0x1f] }
  0x58   : > { %v442_v58 = vrot.slane %v441_v62, 2  ;;  %v535_v59 = vcombine.high %v534_v39, %v534_v39  ;;  %v619_v6 = vmax.f32 %v616_v12, %v618_v14  ;;  %v518_v19 = vcombine.high %v517_v33, %v517_v33  ;;  %v1919_v33 = vld [vmem:[%s1459_s30 + $0x180] sm:$0xff] }
  0x59   : > { %v1277_v11 = vpop.eup %1276  ;;  %vm412_vm7 = vcmp.lt.s32.totalorder %v410_v52, %v411_v15  ;;  %v604_v27 = vmax.f32 %v602_v61, %v603_v9  ;;  %v1175_v48 = vmul.f32 -1.442695, %v1173_v7  ;;  %v773_v60 = vmul.f32 1.442695, %v1173_v7  ;;  %v1922_v9 = vld [vmem:[%s1459_s30 + $0x190] sm:$0xff] }
  0x5a   : > { %v413_v26 = vsel %vm412_vm7, %v410_v52, %v411_v15  ;;  %vm443_vm8 = vcmp.lt.s32.totalorder %v441_v62, %v442_v58  ;;  %v492_v28 = vmul.f32 38.0, %v1277_v11  ;;  %v542_v29 = vrot.slane %v535_v59, %v1478_v25  ;;  %1145 = vst.msk [vmem:[%s1440_s27 + $0x12] ss:$8 sm:$0x3] %vm1612_vm2, %v518_v19 }
  0x5b   : > { %v414_v30 = vrot.slane %v413_v26, 1  ;;  %v444_v31 = vsel %vm443_vm8, %v441_v62, %v442_v58  ;;  %v605_v35 = vrot.slane %v604_v27, 2  ;;  %v620_v36 = vmax.f32 %v619_v6, %v617_v23  ;;  %v1279_v37 = vpop.eup %1278  ;;  %v1916_v62 = vld [vmem:[%s1459_s30 + $0x170] sm:$0xff] }
  0x5c   : > { %v445_v43 = vrot.slane %v444_v31, 1  ;;  %v494_v38 = vadd.f32 %v1434_v4, %v492_v28  ;;  %v543_v47 = vcombine.high %v542_v29, %v542_v29  ;;  %v493_v49 = vmul.f32 38.0, %v1279_v37  ;;  %v1911_v4 = vld [vmem:[%s1459_s30 + $0x160] sm:$0xe0] }
  0x5d   : > { %vm415_vm9 = vcmp.lt.s32.totalorder %v413_v26, %v414_v30  ;;  %v550_v54 = vcombine.high %v1277_v11, %v1279_v37  ;;  %v606_v2 = vmax.f32 %v604_v27, %v605_v35  ;;  %v621_v46 = vrot.slane %v620_v36, 4  ;;  %v2277_v35 = vld [vmem:[#allocation7_spill] sm:$0xff]  ;;  %v2279_v37 = vld [vmem:[#allocation12_spill] sm:$0xff] }
  0x5e   : > { %v416_v55 = vsel %vm415_vm9, %v413_v26, %v414_v30  ;;  %vm446_vm10 = vcmp.lt.s32.totalorder %v444_v31, %v445_v43  ;;  %1143 = vst [vmem:[%s1440_s27 + $0x10] sm:$0x3] %v494_v38  ;;  %1146 = vst.msk [vmem:[%s1440_s27 + $0x13] ss:$8 sm:$0x3] %vm1612_vm2, %v543_v47  ;;  %v495_v14 = vadd.f32 %v493_v49, %v1476_v24  ;;  %1280 = vpow2.f32 %v1175_v48  ;;  %v2275_v30 = vld [vmem:[#allocation6_spill] sm:$0xff] }
  0x5f   : > { %v447_v0 = vsel %vm446_vm10, %v444_v31, %v445_v43  ;;  %v448_v61 = vcvt.s32.f32 %v416_v55  ;;  %v557_v52 = vrot.slane %v550_v54, %v1478_v25  ;;  %v607_v12 = vrot.slane %v606_v2, 1  ;;  %v2276_v31 = vld [vmem:[#allocation8_spill] sm:$0xff]  ;;  %v2280_v43 = vld [vmem:[#allocation14_spill] sm:$0xff] }
  0x60   : > { %v449_v39 = vcvt.s32.f32 %v447_v0  ;;  %v622_v15 = vmax.f32 %v620_v36, %v621_v46  ;;  %1144 = vst [vmem:[%s1440_s27 + $0x18] sm:$0x3] %v495_v14  ;;  %v1176_v59 = vmul.f32 -1.442695, %v1174_v17  ;;  %vm2274_vm12 = vcmask 1047557   ;;  %v2278_v36 = vld [vmem:[#allocation9_spill] sm:$0xff] }
  0x61   : > { %v564_v58 = vrot.slane %v557_v52, %v1478_v25  ;;  %v1928_v23 = vsel %vm2274_vm12, %v1911_v4, -inf  ;;  %v608_v11 = vmax.f32 %v606_v2, %v607_v12  ;;  %1282 = vpow2.f32 %v773_v60  ;;  %v2281_v48 = vld [vmem:[#allocation10_spill] sm:$0xff]  ;;  %v2282_v0 = vld [vmem:[#allocation11_spill] sm:$0xff] }
  0x62   : > { %v452_v6 = vcombine.low %v448_v61, %v449_v39  ;;  %v623_v19 = vrot.slane %v622_v15, 2  ;;  %1284 = vpow2.f32 %v1176_v59  ;;  %v1933_v27 = vmul.f32 1.442695, %v1174_v17  ;;  %v2283_v61 = vld [vmem:[#allocation13_spill] sm:$0xff]  ;;  %v2284_v14 = vld [vmem:[#allocation15_spill] sm:$0xff] }
  0x63   : > { %1147 = vst.msk [vmem:[%s1440_s27 + $0x14] ss:$8 sm:$0x3] %vm1612_vm2, %v564_v58  ;;  %v877_v7 = vmax.f32 %v1928_v23, %v1919_v33  ;;  %v878_v26 = vmax.f32 %v1916_v62, %v1922_v9  ;;  %vm627_vm13 = vcmp.ge.f32.partialorder %v2275_v30, %v608_v11  ;;  %vm629_vm14 = vcmp.ge.f32.partialorder %v2276_v31, %v608_v11  ;;  %v2055_v23 = vld [vmem:[%s1459_s30 + $0x1f0] sm:$0xff] }
  0x64   : > { %v459_v28 = vrot.slane %v452_v6, %v1478_v25  ;;  %v624_v29 = vmax.f32 %v622_v15, %v623_v19  ;;  %vm631_vm15 = vcmp.ge.f32.partialorder %v2277_v35, %v608_v11  ;;  %vm633_vm1 = vcmp.ge.f32.partialorder %v2278_v36, %v608_v11 }
  0x65   : > { %vm635_vm3 = vcmp.ge.f32.partialorder %v2279_v37, %v608_v11  ;;  %vm637_vm4 = vcmp.ge.f32.partialorder %v2280_v43, %v608_v11  ;;  %vm639_vm5 = vcmp.ge.f32.partialorder %v1655_v5, %v608_v11  ;;  %vm641_vm0 = vcmp.ge.f32.partialorder %v1667_v34, %v608_v11 }
  0x66   : > { %v466_v38 = vrot.slane %v459_v28, %v1478_v25  ;;  %v625_v47 = vrot.slane %v624_v29, 1  ;;  %vm643_vm11 = vcmp.ge.f32.partialorder %v1674_v32, %v608_v11  ;;  %vm645_vm6 = vcmp.ge.f32.partialorder %v1682_v13, %v608_v11 }
  0x67   : > { %vm647_vm7 = vcmp.ge.f32.partialorder %v2281_v48, %v608_v11  ;;  %v649_v49 = vsel %vm627_vm13, %v1467_v16, 80  ;;  %v651_v2 = vsel %vm629_vm14, %v1529_v45, 80  ;;  %v653_v17 = vsel %vm631_vm15, %v1555_v57, 80 }
  0x68   : > { %1138 = vst.msk [vmem:[%s1440_s27 + $0x5] ss:$8 sm:$0x3] %vm1612_vm2, %v466_v38  ;;  %v626_v54 = vmax.f32 %v624_v29, %v625_v47  ;;  %v655_v5 = vsel %vm633_vm1, %v1578_v8, 80  ;;  %v657_v34 = vsel %vm635_vm3, %v1584_v18, 80  ;;  %v659_v55 = vsel %vm637_vm4, %v1589_v21, 80  ;;  %v1967_v52 = vpop.eup %1280 }
  0x69   : > { %v661_v46 = vsel %vm639_vm5, %v1598_v40, 80  ;;  %v663_v60 = vsel %vm641_vm0, %v1601_v44, 80  ;;  %v667_v59 = vsel %vm645_vm6, %v1609_v63, 80  ;;  %v669_v19 = vsel %vm647_vm7, %v2267_v10, 80 }
  0x6a   : > { %vm628_vm8 = vcmp.ge.f32.partialorder %v2282_v0, %v626_v54  ;;  %vm630_vm9 = vcmp.ge.f32.partialorder %v1649_v1, %v626_v54  ;;  %vm632_vm10 = vcmp.ge.f32.partialorder %v2283_v61, %v626_v54  ;;  %vm634_vm12 = vcmp.ge.f32.partialorder %v2284_v14, %v626_v54  ;;  %v2007_v61 = vld [vmem:[%s1459_s30 + $0x1a0] sm:$0xff] }
  0x6b   : > { %vm636_vm13 = vcmp.ge.f32.partialorder %v1664_v22, %v626_v54  ;;  %vm638_vm14 = vcmp.ge.f32.partialorder %v1679_v51, %v626_v54  ;;  %vm640_vm15 = vcmp.ge.f32.partialorder %v1870_v41, %v626_v54  ;;  %vm642_vm1 = vcmp.ge.f32.partialorder %v1873_v42, %v626_v54  ;;  %v1973_v39 = vpop.eup %1282 }
  0x6c   : > { %vm644_vm3 = vcmp.ge.f32.partialorder %v1880_v53, %v626_v54  ;;  %vm646_vm4 = vcmp.ge.f32.partialorder %v1890_v20, %v626_v54  ;;  %vm648_vm5 = vcmp.ge.f32.partialorder %v1877_v50, %v626_v54  ;;  %v650_v1 = vsel %vm628_vm8, %v1467_v16, 80  ;;  %v1285_v12 = vpop.eup %1284 }
  0x6d   : > { %v652_v15 = vsel %vm630_vm9, %v1529_v45, 80  ;;  %v654_v22 = vsel %vm632_vm10, %v1555_v57, 80  ;;  %v656_v51 = vsel %vm634_vm12, %v1578_v8, 80  ;;  %v658_v41 = vsel %vm636_vm13, %v1584_v18, 80 }
  0x6e   : > { %v660_v42 = vsel %vm638_vm14, %v1589_v21, 80  ;;  %v662_v58 = vsel %vm640_vm15, %v1598_v40, 80  ;;  %v664_v53 = vsel %vm642_vm1, %v1601_v44, 80  ;;  %v665_v50 = vsel %vm643_vm11, %v1604_v56, 80 }
  0x6f   : > { %v666_v20 = vsel %vm644_vm3, %v1604_v56, 80  ;;  %v668_v6 = vsel %vm646_vm4, %v1609_v63, 80  ;;  %v670_v28 = vsel %vm648_vm5, %v2267_v10, 80  ;;  %vm2285_vm0 = vcmask 1047557  }
  0x70   : > { %v671_v29 = vsel %vm2285_vm0, %v649_v49, 2147483647  ;;  %vm674_vm8 = vcmp.lt.s32.totalorder %v651_v2, %v655_v5  ;;  %vm2286_vm9 = vcmask 1044480   ;;  %vm2287_vm10 = vmmov %vm2285_vm0  ;;  %vm705_vm12 = vcmp.lt.s32.totalorder %v652_v15, %v656_v51 }
  0x71   : > { %v688_v32 = vsel %vm2286_vm9, %v669_v19, 2147483647  ;;  %vm672_vm11 = vcmp.lt.s32.totalorder %v671_v29, %v653_v17  ;;  %v675_v30 = vsel %vm674_vm8, %v651_v2, %v655_v5  ;;  %v702_v31 = vsel %vm2287_vm10, %v650_v1, 2147483647  ;;  %v2011_v1 = vld [vmem:[%s1459_s30 + $0x188] sm:$0xff]  ;;  %v2044_v19 = vld [vmem:[%s1459_s30 + $0x1e0] sm:$0xff] }
  0x72   : > { %v673_v13 = vsel %vm672_vm11, %v671_v29, %v653_v17  ;;  %vm678_vm6 = vcmp.lt.s32.totalorder %v675_v30, %v659_v55  ;;  %vm703_vm13 = vcmp.lt.s32.totalorder %v702_v31, %v654_v22  ;;  %v706_v35 = vsel %vm705_vm12, %v652_v15, %v656_v51  ;;  %v2002_v17 = vld [vmem:[%s1459_s30 + $0x168] sm:$0xe0]  ;;  %v2014_v15 = vld [vmem:[%s1459_s30 + $0x1b0] sm:$0xff]  ;;  %v2022_v51 = vld [vmem:[%s1459_s30 + $0x198] sm:$0xff] }
  0x73   : > { %vm676_vm14 = vcmp.lt.s32.totalorder %v673_v13, %v657_v34  ;;  %v679_v36 = vsel %vm678_vm6, %v675_v30, %v659_v55  ;;  %v704_v11 = vsel %vm703_vm13, %v702_v31, %v654_v22  ;;  %vm709_vm7 = vcmp.lt.s32.totalorder %v706_v35, %v660_v42  ;;  %v2052_v30 = vld [vmem:[%s1459_s30 + $0x1c8] sm:$0xff] }
  0x74   : > { %v677_v37 = vsel %vm676_vm14, %v673_v13, %v657_v34  ;;  %vm682_vm15 = vcmp.lt.s32.totalorder %v679_v36, %v663_v60  ;;  %vm707_vm1 = vcmp.lt.s32.totalorder %v704_v11, %v658_v41  ;;  %v710_v43 = vsel %vm709_vm7, %v706_v35, %v660_v42  ;;  %v2028_v42 = vld [vmem:[%s1459_s30 + $0x1a8] sm:$0xff]  ;;  %v2061_v13 = vld [vmem:[%s1459_s30 + $0x1d8] sm:$0xff] }
  0x75   : > { %vm680_vm3 = vcmp.lt.s32.totalorder %v677_v37, %v661_v46  ;;  %v683_v38 = vsel %vm682_vm15, %v679_v36, %v663_v60  ;;  %v708_v47 = vsel %vm707_vm1, %v704_v11, %v658_v41  ;;  %vm713_vm4 = vcmp.lt.s32.totalorder %v710_v43, %v664_v53  ;;  %v2025_v41 = vld [vmem:[%s1459_s30 + $0x1c0] sm:$0xff] }
  0x76   : > { %v681_v48 = vsel %vm680_vm3, %v677_v37, %v661_v46  ;;  %vm686_vm5 = vcmp.lt.s32.totalorder %v683_v38, %v667_v59  ;;  %vm711_vm0 = vcmp.lt.s32.totalorder %v708_v47, %v662_v58  ;;  %v714_v49 = vsel %vm713_vm4, %v710_v43, %v664_v53  ;;  %v2034_v53 = vld [vmem:[%s1459_s30 + $0x200] sm:$0x1f]  ;;  %v2068_v37 = vld [vmem:[%s1459_s30 + $0x1e8] sm:$0xff] }
  0x77   : > { %vm684_vm8 = vcmp.lt.s32.totalorder %v681_v48, %v665_v50  ;;  %v687_v54 = vsel %vm686_vm5, %v683_v38, %v667_v59  ;;  %v712_v2 = vsel %vm711_vm0, %v708_v47, %v662_v58  ;;  %vm717_vm9 = vcmp.lt.s32.totalorder %v714_v49, %v668_v6  ;;  %v2031_v58 = vld [vmem:[%s1459_s30 + $0x1d0] sm:$0xff]  ;;  %v2071_v43 = vld [vmem:[%s1459_s30 + $0x208] sm:$0x1f] }
  0x78   : > { %v685_v5 = vsel %vm684_vm8, %v681_v48, %v665_v50  ;;  %vm715_vm11 = vcmp.lt.s32.totalorder %v712_v2, %v666_v20  ;;  %v718_v34 = vsel %vm717_vm9, %v714_v49, %v668_v6  ;;  %vm2288_vm10 = vcmask 1044480   ;;  %v2041_v6 = vld [vmem:[%s1459_s30 + $0x1b8] sm:$0xff] }
  0x79   : > { %v719_v55 = vsel %vm2288_vm10, %v670_v28, 2147483647  ;;  %vm689_vm12 = vcmp.lt.s32.totalorder %v685_v5, %v688_v32  ;;  %v716_v46 = vsel %vm715_vm11, %v712_v2, %v666_v20  ;;  %v767_v60 = vadd.f32 1.0, %v1967_v52  ;;  %vm2290_vm1 = vmmov %vm2288_vm10 }
  0x7a   : > { %v768_v0 = vadd.f32 1.0, %v1285_v12  ;;  %v690_v14 = vsel %vm689_vm12, %v685_v5, %v688_v32  ;;  %vm720_vm6 = vcmp.lt.s32.totalorder %v716_v46, %v719_v55  ;;  %1286 = vpow2.f32 %v1933_v27  ;;  %v2019_v12 = vld [vmem:[%s1459_s30 + $0x178] sm:$0xff]  ;;  %vm2291_vm5 = vmmov %vm2290_vm1 }
  0x7b   : > { %vm2289_vm13 = vcmask 1047557   ;;  %vm691_vm14 = vcmp.lt.s32.totalorder %v690_v14, %v687_v54  ;;  %v721_v52 = vsel %vm720_vm6, %v716_v46, %v719_v55  ;;  %1288 = vrcp.f32 %v767_v60 }
  0x7c   : > { %v894_v22 = vsel %vm2289_vm13, %v2002_v17, -inf  ;;  %v692_v27 = vsel %vm691_vm14, %v690_v14, %v687_v54  ;;  %vm722_vm7 = vcmp.lt.s32.totalorder %v721_v52, %v718_v34  ;;  %1290 = vrcp.f32 %v768_v0  ;;  %v2076_v54 = vld [vmem:[%s1459_s30 + $0x1f8] sm:$0xff] }
  0x7d   : > { %v879_v50 = vmax.f32 %v877_v7, %v2007_v61  ;;  %v693_v20 = vrot.slane %v692_v27, 4  ;;  %v723_v59 = vsel %vm722_vm7, %v721_v52, %v718_v34  ;;  %v880_v28 = vmax.f32 %v878_v26, %v2014_v15 }
  0x7e   : > { %v895_v29 = vmax.f32 %v894_v22, %v2011_v1  ;;  %v724_v32 = vrot.slane %v723_v59, 4  ;;  %v896_v31 = vmax.f32 %v2019_v12, %v2022_v51  ;;  %v885_v26 = vsel %vm2290_vm1, %v2034_v53, -inf }
  0x7f   : > { %v881_v7 = vmax.f32 %v879_v50, %v2025_v41  ;;  %vm694_vm15 = vcmp.lt.s32.totalorder %v692_v27, %v693_v20  ;;  %v882_v35 = vmax.f32 %v880_v28, %v2031_v58  ;;  %v784_v55 = vmul.f32 373.0, %v1973_v39 }
  0x80   : > { %v897_v36 = vmax.f32 %v895_v29, %v2028_v42  ;;  %v695_v11 = vsel %vm694_vm15, %v692_v27, %v693_v20  ;;  %vm725_vm3 = vcmp.lt.s32.totalorder %v723_v59, %v724_v32  ;;  %v898_v47 = vmax.f32 %v896_v31, %v2041_v6 }
  0x81   : > { %v883_v38 = vmax.f32 %v881_v7, %v2044_v19  ;;  %v696_v48 = vrot.slane %v695_v11, 2  ;;  %v726_v49 = vsel %vm725_vm3, %v723_v59, %v724_v32  ;;  %v884_v2 = vmax.f32 %v882_v35, %v2055_v23 }
  0x82   : > { %v899_v5 = vmax.f32 %v897_v36, %v2052_v30  ;;  %v727_v34 = vrot.slane %v726_v49, 2  ;;  %v900_v60 = vmax.f32 %v898_v47, %v2061_v13  ;;  %v808_v0 = vmul.f32 326.0, %v1973_v39 }
  0x83   : > { %v886_v46 = vmax.f32 %v883_v38, %v885_v26  ;;  %vm697_vm4 = vcmp.lt.s32.totalorder %v695_v11, %v696_v48  ;;  %v903_v22 = vsel %vm2291_vm5, %v2071_v43, -inf }
  0x84   : > { %v901_v14 = vmax.f32 %v899_v5, %v2068_v37  ;;  %v1287_v52 = vpop.eup %1286  ;;  %v698_v27 = vsel %vm697_vm4, %v695_v11, %v696_v48  ;;  %vm728_vm0 = vcmp.lt.s32.totalorder %v726_v49, %v727_v34  ;;  %v902_v20 = vmax.f32 %v900_v60, %v2076_v54 }
  0x85   : > { %v887_v50 = vmax.f32 %v886_v46, %v884_v2  ;;  %v1289_v59 = vpop.eup %1288  ;;  %v699_v28 = vrot.slane %v698_v27, 1  ;;  %v729_v29 = vsel %vm728_vm0, %v726_v49, %v727_v34  ;;  %v785_v32 = vmul.f32 373.0, %v1287_v52  ;;  %v1292_v2 = vld.sshfl [vmem:[%s2226_s0] sm:$0x33 pattern:$0x76325410] }
  0x86   : > { %v809_v7 = vmul.f32 326.0, %v1287_v52  ;;  %v1291_v31 = vpop.eup %1290  ;;  %v730_v35 = vrot.slane %v729_v29, 1  ;;  %v777_v26 = vmul.f32 38.0, %v1289_v59  ;;  %v904_v36 = vmax.f32 %v901_v14, %v903_v22 }
  0x87   : > { %v888_v39 = vrot.slane %v887_v50, 4  ;;  %vm700_vm8 = vcmp.lt.s32.totalorder %v698_v27, %v699_v28  ;;  %v778_v38 = vmul.f32 38.0, %v1291_v31  ;;  %v788_v47 = vcombine.low %v784_v55, %v785_v32 }
  0x88   : > { %v812_v11 = vcombine.low %v808_v0, %v809_v7  ;;  %v701_v48 = vsel %vm700_vm8, %v698_v27, %v699_v28  ;;  %vm731_vm9 = vcmp.lt.s32.totalorder %v729_v29, %v730_v35  ;;  %v779_v49 = vadd.f32 %v1292_v2, %v777_v26 }
  0x89   : > { %v835_v5 = vcombine.high %v1289_v59, %v1291_v31  ;;  %v732_v34 = vsel %vm731_vm9, %v729_v29, %v730_v35  ;;  %v733_v46 = vcvt.s32.f32 %v701_v48  ;;  %v780_v60 = vadd.f32 %v778_v38, %v1476_v24 }
  0x8a   : > { %v795_v52 = vrot.slane %v788_v47, %v1478_v25  ;;  %v734_v14 = vcvt.s32.f32 %v732_v34  ;;  %1177 = vst [vmem:[%s1440_s27 + $0x20] sm:$0x3] %v779_v49  ;;  %v819_v55 = vrot.slane %v812_v11, %v1478_v25  ;;  %v889_v22 = vmax.f32 %v887_v50, %v888_v39 }
  0x8b   : > { %v842_v0 = vrot.slane %v835_v5, %v1478_v25  ;;  %1178 = vst [vmem:[%s1440_s27 + $0x28] sm:$0x3] %v780_v60  ;;  %v905_v28 = vmax.f32 %v904_v36, %v902_v20 }
  0x8c   : > { %v802_v27 = vrot.slane %v795_v52, %v1478_v25  ;;  %v737_v59 = vcombine.low %v733_v46, %v734_v14  ;;  %v820_v29 = vcombine.high %v819_v55, %v819_v55  ;;  %v890_v32 = vrot.slane %v889_v22, 2 }
  0x8d   : > { %v849_v24 = vrot.slane %v842_v0, %v1478_v25  ;;  %v906_v31 = vrot.slane %v905_v28, 4 }
  0x8e   : > { %v803_v7 = vcombine.high %v802_v27, %v802_v27  ;;  %v744_v35 = vrot.slane %v737_v59, %v1478_v25  ;;  %v827_v26 = vrot.slane %v820_v29, %v1478_v25  ;;  %v891_v50 = vmax.f32 %v889_v22, %v890_v32 }
  0x8f   : > { %1181 = vst.msk [vmem:[%s1440_s27 + $0x24] ss:$8 sm:$0x3] %vm1612_vm2, %v849_v24  ;;  %v907_v20 = vmax.f32 %v905_v28, %v906_v31 }
  0x90   : > { %1179 = vst.msk [vmem:[%s1440_s27 + $0x22] ss:$8 sm:$0x3] %vm1612_vm2, %v803_v7  ;;  %v751_v39 = vrot.slane %v744_v35, %v1478_v25  ;;  %v828_v36 = vcombine.high %v827_v26, %v827_v26  ;;  %v892_v38 = vrot.slane %v891_v50, 1 }
  0x91   : > { %v908_v47 = vrot.slane %v907_v20, 2 }
  0x92   : > { %1170 = vst.msk [vmem:[%s1440_s27 + $0x15] ss:$8 sm:$0x3] %vm1612_vm2, %v751_v39  ;;  %1180 = vst.msk [vmem:[%s1440_s27 + $0x23] ss:$8 sm:$0x3] %vm1612_vm2, %v828_v36  ;;  %v893_v11 = vmax.f32 %v891_v50, %v892_v38 }
  0x93   : > { %v909_v48 = vmax.f32 %v907_v20, %v908_v47 }
  0x94   : > { %vm912_vm11 = vcmp.ge.f32.partialorder %v1911_v4, %v893_v11  ;;  %vm914_vm10 = vcmp.ge.f32.partialorder %v1916_v62, %v893_v11  ;;  %vm916_vm12 = vcmp.ge.f32.partialorder %v1919_v33, %v893_v11  ;;  %vm918_vm6 = vcmp.ge.f32.partialorder %v1922_v9, %v893_v11 }
  0x95   : > { %v910_v2 = vrot.slane %v909_v48, 1  ;;  %vm920_vm13 = vcmp.ge.f32.partialorder %v2007_v61, %v893_v11  ;;  %vm922_vm14 = vcmp.ge.f32.partialorder %v2014_v15, %v893_v11  ;;  %vm924_vm7 = vcmp.ge.f32.partialorder %v2025_v41, %v893_v11 }
  0x96   : > { %vm926_vm15 = vcmp.ge.f32.partialorder %v2031_v58, %v893_v11  ;;  %vm928_vm1 = vcmp.ge.f32.partialorder %v2044_v19, %v893_v11  ;;  %vm930_vm3 = vcmp.ge.f32.partialorder %v2055_v23, %v893_v11  ;;  %vm932_vm4 = vcmp.ge.f32.partialorder %v2034_v53, %v893_v11 }
  0x97   : > { %v911_v4 = vmax.f32 %v909_v48, %v910_v2  ;;  %v934_v62 = vsel %vm912_vm11, %v1467_v16, 80  ;;  %v936_v33 = vsel %vm914_vm10, %v1529_v45, 80  ;;  %v938_v9 = vsel %vm916_vm12, %v1555_v57, 80 }
  0x98   : > { %v940_v61 = vsel %vm918_vm6, %v1578_v8, 80  ;;  %v942_v15 = vsel %vm920_vm13, %v1584_v18, 80  ;;  %v944_v41 = vsel %vm922_vm14, %v1589_v21, 80  ;;  %v946_v49 = vsel %vm924_vm7, %v1598_v40, 80 }
  0x99   : > { %vm913_vm5 = vcmp.ge.f32.partialorder %v2002_v17, %v911_v4  ;;  %vm915_vm0 = vcmp.ge.f32.partialorder %v2019_v12, %v911_v4  ;;  %vm917_vm8 = vcmp.ge.f32.partialorder %v2011_v1, %v911_v4  ;;  %vm919_vm9 = vcmp.ge.f32.partialorder %v2022_v51, %v911_v4 }
  0x9a   : > { %vm921_vm11 = vcmp.ge.f32.partialorder %v2028_v42, %v911_v4  ;;  %vm923_vm10 = vcmp.ge.f32.partialorder %v2041_v6, %v911_v4  ;;  %vm925_vm12 = vcmp.ge.f32.partialorder %v2052_v30, %v911_v4  ;;  %vm927_vm6 = vcmp.ge.f32.partialorder %v2061_v13, %v911_v4 }
  0x9b   : > { %vm929_vm13 = vcmp.ge.f32.partialorder %v2068_v37, %v911_v4  ;;  %vm931_vm14 = vcmp.ge.f32.partialorder %v2076_v54, %v911_v4  ;;  %vm933_vm7 = vcmp.ge.f32.partialorder %v2071_v43, %v911_v4  ;;  %v935_v17 = vsel %vm913_vm5, %v1467_v16, 80 }
  0x9c   : > { %v937_v1 = vsel %vm915_vm0, %v1529_v45, 80  ;;  %v939_v12 = vsel %vm917_vm8, %v1555_v57, 80  ;;  %v941_v51 = vsel %vm919_vm9, %v1578_v8, 80  ;;  %v943_v42 = vsel %vm921_vm11, %v1584_v18, 80 }
  0x9d   : > { %v945_v6 = vsel %vm923_vm10, %v1589_v21, 80  ;;  %v947_v30 = vsel %vm925_vm12, %v1598_v40, 80  ;;  %v948_v13 = vsel %vm926_vm15, %v1601_v44, 80  ;;  %v949_v37 = vsel %vm927_vm6, %v1601_v44, 80 }
  0x9e   : > { %v950_v16 = vsel %vm928_vm1, %v1604_v56, 80  ;;  %v951_v45 = vsel %vm929_vm13, %v1604_v56, 80  ;;  %v952_v57 = vsel %vm930_vm3, %v1609_v63, 80  ;;  %v953_v8 = vsel %vm931_vm14, %v1609_v63, 80 }
  0x9f   : > { %v954_v18 = vsel %vm932_vm4, %v2267_v10, 80  ;;  %v955_v21 = vsel %vm933_vm7, %v2267_v10, 80  ;;  %vm2292_vm15 = vcmask 1047557   ;;  %vm959_vm5 = vcmp.lt.s32.totalorder %v936_v33, %v940_v61 }
  0xa0   : > { %v956_v40 = vsel %vm2292_vm15, %v934_v62, 2147483647  ;;  %v960_v44 = vsel %vm959_vm5, %v936_v33, %v940_v61  ;;  %vm2293_vm1 = vcmask 1044480   ;;  %vm2294_vm8 = vmmov %vm2292_vm15  ;;  %vm990_vm11 = vcmp.lt.s32.totalorder %v937_v1, %v941_v51 }
  0xa1   : > { %vm957_vm0 = vcmp.lt.s32.totalorder %v956_v40, %v938_v9  ;;  %v973_v58 = vsel %vm2293_vm1, %v954_v18, 2147483647  ;;  %v987_v56 = vsel %vm2294_vm8, %v935_v17, 2147483647  ;;  %vm963_vm9 = vcmp.lt.s32.totalorder %v960_v44, %v944_v41 }
  0xa2   : > { %v958_v19 = vsel %vm957_vm0, %v956_v40, %v938_v9  ;;  %vm988_vm3 = vcmp.lt.s32.totalorder %v987_v56, %v939_v12  ;;  %v964_v63 = vsel %vm963_vm9, %v960_v44, %v944_v41  ;;  %v991_v53 = vsel %vm990_vm11, %v937_v1, %v941_v51 }
  0xa3   : > { %vm961_vm10 = vcmp.lt.s32.totalorder %v958_v19, %v942_v15  ;;  %v989_v23 = vsel %vm988_vm3, %v987_v56, %v939_v12  ;;  %vm967_vm4 = vcmp.lt.s32.totalorder %v964_v63, %v948_v13  ;;  %vm994_vm6 = vcmp.lt.s32.totalorder %v991_v53, %v945_v6 }
  0xa4   : > { %v962_v43 = vsel %vm961_vm10, %v958_v19, %v942_v15  ;;  %vm992_vm12 = vcmp.lt.s32.totalorder %v989_v23, %v943_v42  ;;  %v968_v10 = vsel %vm967_vm4, %v964_v63, %v948_v13  ;;  %v995_v5 = vsel %vm994_vm6, %v991_v53, %v945_v6 }
  0xa5   : > { %vm965_vm13 = vcmp.lt.s32.totalorder %v962_v43, %v946_v49  ;;  %v993_v54 = vsel %vm992_vm12, %v989_v23, %v943_v42  ;;  %vm971_vm14 = vcmp.lt.s32.totalorder %v968_v10, %v952_v57  ;;  %vm998_vm15 = vcmp.lt.s32.totalorder %v995_v5, %v949_v37 }
  0xa6   : > { %v966_v34 = vsel %vm965_vm13, %v962_v43, %v946_v49  ;;  %vm996_vm7 = vcmp.lt.s32.totalorder %v993_v54, %v947_v30  ;;  %v972_v46 = vsel %vm971_vm14, %v968_v10, %v952_v57  ;;  %v999_v52 = vsel %vm998_vm15, %v995_v5, %v949_v37 }
  0xa7   : > { %vm969_vm5 = vcmp.lt.s32.totalorder %v966_v34, %v950_v16  ;;  %v997_v60 = vsel %vm996_vm7, %v993_v54, %v947_v30  ;;  %vm1002_vm1 = vcmp.lt.s32.totalorder %v999_v52, %v953_v8  ;;  %vm2295_vm8 = vcmask 1044480  }
  0xa8   : > { %v970_v14 = vsel %vm969_vm5, %v966_v34, %v950_v16  ;;  %vm1000_vm0 = vcmp.lt.s32.totalorder %v997_v60, %v951_v45  ;;  %v1004_v55 = vsel %vm2295_vm8, %v955_v21, 2147483647  ;;  %v1003_v22 = vsel %vm1002_vm1, %v999_v52, %v953_v8 }
  0xa9   : > { %vm974_vm9 = vcmp.lt.s32.totalorder %v970_v14, %v973_v58  ;;  %v1001_v0 = vsel %vm1000_vm0, %v997_v60, %v951_v45 }
  0xaa   : > { %v975_v27 = vsel %vm974_vm9, %v970_v14, %v973_v58  ;;  %vm1005_vm3 = vcmp.lt.s32.totalorder %v1001_v0, %v1004_v55 }
  0xab   : > { %vm976_vm11 = vcmp.lt.s32.totalorder %v975_v27, %v972_v46  ;;  %v1006_v28 = vsel %vm1005_vm3, %v1001_v0, %v1004_v55 }
  0xac   : > { %v977_v59 = vsel %vm976_vm11, %v975_v27, %v972_v46  ;;  %vm1007_vm10 = vcmp.lt.s32.totalorder %v1006_v28, %v1003_v22 }
  0xad   : > { %v978_v29 = vrot.slane %v977_v59, 4  ;;  %v1008_v24 = vsel %vm1007_vm10, %v1006_v28, %v1003_v22 }
  0xae   : > { %v1009_v32 = vrot.slane %v1008_v24, 4 }
  0xaf   : > { %vm979_vm4 = vcmp.lt.s32.totalorder %v977_v59, %v978_v29 }
  0xb0   : > { %v980_v7 = vsel %vm979_vm4, %v977_v59, %v978_v29  ;;  %vm1010_vm12 = vcmp.lt.s32.totalorder %v1008_v24, %v1009_v32 }
  0xb1   : > { %v981_v31 = vrot.slane %v980_v7, 2  ;;  %v1011_v35 = vsel %vm1010_vm12, %v1008_v24, %v1009_v32 }
  0xb2   : > { %v1012_v26 = vrot.slane %v1011_v35, 2 }
  0xb3   : > { %vm982_vm6 = vcmp.lt.s32.totalorder %v980_v7, %v981_v31 }
  0xb4   : > { %v983_v50 = vsel %vm982_vm6, %v980_v7, %v981_v31  ;;  %vm1013_vm13 = vcmp.lt.s32.totalorder %v1011_v35, %v1012_v26 }
  0xb5   : > { %v984_v20 = vrot.slane %v983_v50, 1  ;;  %v1014_v39 = vsel %vm1013_vm13, %v1011_v35, %v1012_v26 }
  0xb6   : > { %v1015_v36 = vrot.slane %v1014_v39, 1 }
  0xb7   : > { %vm985_vm14 = vcmp.lt.s32.totalorder %v983_v50, %v984_v20 }
  0xb8   : > { %v986_v38 = vsel %vm985_vm14, %v983_v50, %v984_v20  ;;  %vm1016_vm7 = vcmp.lt.s32.totalorder %v1014_v39, %v1015_v36 }
  0xb9   : > { %v1017_v47 = vsel %vm1016_vm7, %v1014_v39, %v1015_v36  ;;  %v1018_v11 = vcvt.s32.f32 %v986_v38 }
  0xba   : > { %v1019_v48 = vcvt.s32.f32 %v1017_v47 }
  0xbc   : > { %v1022_v2 = vcombine.low %v1018_v11, %v1019_v48 }
  0xbe   : > { %v1029_v4 = vrot.slane %v1022_v2, %v1478_v25 }
  0xc0   : > { %v1036_v62 = vrot.slane %v1029_v4, %v1478_v25 }
  0xc2   : > { %1204 = vst.msk [vmem:[%s1440_s27 + $0x25] ss:$8 sm:$0x3] %vm1612_vm2, %v1036_v62 }
  0xc3   : > { %1306 = shalt.err (!%p1303_p3)
}
  0xc4   : > { %s1307_s21 = scalar_lea.hbm %s2175_s14, 768  ;;  %s1311_s26 = scalar_lea.hbm %s2228_s2, 1536 }
  0xc5   : > { %p1308_p4 = scmp.ne.s32.totalorder %s2175_s14, %s1307_s21  ;;  %p1312_p9 = scmp.lt.u32.totalorder %s2175_s14, %s2228_s2 }
  0xc6   : > { %p1313_p10 = scmp.lt.u32.totalorder %s1311_s26, %s1307_s21  ;;  %p1315_p12 = scmp.lt.u32.totalorder %s1307_s21, %s2175_s14 }
  0xc7   : > { %p1309_p7 = pnand %p1308_p4, %p1415_p5 }
  0xc8   : > { %p1314_p11 = por %p1313_p10, %p1312_p9 }
  0xc9   : > { %p1310_p8 = pneg %p1309_p7 }
  0xca   : > { %p1316_p13 = por %p1315_p12, %p1314_p11 }
  0xcc   : > { %p1317_p0 = pnand %p1316_p13, %p1310_p8 }
  0xce   : > { %1320 = shalt.err (!%p1317_p0)
}
  0xcf   : > { %s1360_s29 = smov 256   ;;  %s1361_s30 = smov 16  }
  0xd0   : > { %1213 = dma.vmem_to_hbm [thread:$0]  (%p1415_p5), %s2177_s6, 768, %s2175_s14, %s2185_s13, %s1360_s29, %s1360_s29, %s1361_s30  }
  0xd1 PF: > { %p1219_p1 = scmp.ge.s32.totalorder %s1355_s12, 2  ;;  %s1072_s3 = sand.u32 1, %s1343_s9  }
  0xd2   : > { %s1073_s4 = scalar_lea.sflag [#allocation3], %s1072_s3 }
  0xd3   : > { %p1216_p2 = pnand %p1219_p1, %p1419_p6 }
  0xd5   : > { %1338 = dma.done.wait (!%p1216_p2), %s1073_s4, 768  }
  0xd6   : > { %1340 = vsyncadd (!%p1216_p2), %s1073_s4, 4294966528  ;;  %p12_p3 = scmp.ge.s32.totalorder %s1402_s15, 4   ;;  %s2296_s9 = smov %s1347_s10 }
  0xd7   : > { %s2297_s10 = smov %s1351_s11  ;;  %s2298_s11 = smov %s1413_s18 }
  0xd8   : > { %s2299_s12 = smov %s1402_s15  ;;  %14 = sbr.rel (!%p12_p3) target bundleno = 3 (0x3), region = 79 }
  0xdf   :  { %1078 = vsyncpa [#allocation3], 1 }
  0xe0   :  { %1080 = vsyncpa [#allocation3 + $0x1], 1 }

</bundles_post_ra>
